<compile_context>
chip_gen: v5e
topology: v5e:2x2
jax: 0.10.0
libtpu: 0.0.40
codegen_flags: <defaults>
</compile_context>

<pallas_src>
import functools

import jax
import jax.numpy as jnp
from jax.experimental import pallas as pl
from jax.experimental.pallas import tpu as pltpu

LANE = 128
SUBLANE = 8
MAX_TILE_M = 512
BN_EPS = 1e-5
LRELU_SLOPE = 0.2
VMEM_LIMIT = 32 * 1024 * 1024


def _round_up(x, m):
    return ((x + m - 1) // m) * m


def _tiles(m):
    """(tile_m, m_padded) for the M (rows) grid axis."""
    if m <= MAX_TILE_M:
        t = _round_up(m, SUBLANE)
        return t, t
    return MAX_TILE_M, _round_up(m, MAX_TILE_M)


# ---------------------------------------------------------------------------
# Pallas kernels
# ---------------------------------------------------------------------------
def _apply_act(y, act):
    if act == "lrelu":
        return jnp.where(y >= 0.0, y, LRELU_SLOPE * y)
    if act == "relu":
        return jnp.maximum(y, 0.0)
    if act == "tanh":
        return jnp.tanh(y)  # EUP op: essentially free next to the MXU/VPU work
    return y


def _matmul_act_kernel(p_ref, w_ref, o_ref, *, act):
    # p_ref: (TILE_M, Kd) bf16   w_ref: (Kd, Cout_pad) bf16   o_ref: f32
    y = jnp.dot(p_ref[...], w_ref[...], preferred_element_type=jnp.float32)
    o_ref[...] = _apply_act(y, act)


def _bn_act_kernel(y_ref, scale_ref, shift_ref, o_ref, *, act):
    # y_ref: (TILE_M, C_pad) f32, scale/shift: (1, C_pad) f32
    y = y_ref[...] * scale_ref[...] + shift_ref[...]
    o_ref[...] = _apply_act(y, act)


# ---------------------------------------------------------------------------
# Pallas wrappers
# ---------------------------------------------------------------------------
def _pallas_matmul(patches, w_t, act):
    """(M, Kd) @ (Kd, Cout) on the MXU with fused activation.

    Inputs are zero-padded to (M_pad, Kd_pad) / (Kd_pad, Cout_pad) with the lane
    dims a multiple of 128 and cast to bf16 (f32 accumulate).  Returns the padded
    (M_pad, Cout_pad) f32 result; caller slices [:M, :Cout].  Padded rows/cols
    are exactly zero.
    """
    m, kd = patches.shape
    cout = w_t.shape[1]
    kd_p = _round_up(kd, LANE)
    cout_p = _round_up(cout, LANE)
    tile_m, m_p = _tiles(m)

    p = jnp.zeros((m_p, kd_p), jnp.bfloat16).at[:m, :kd].set(
        patches.astype(jnp.bfloat16))
    w = jnp.zeros((kd_p, cout_p), jnp.bfloat16).at[:kd, :cout].set(
        w_t.astype(jnp.bfloat16))

    cost = pl.CostEstimate(
        flops=2 * m_p * kd_p * cout_p,
        transcendentals=m_p * cout_p if act == "tanh" else 0,
        bytes_accessed=p.size * 2 + w.size * 2 + m_p * cout_p * 4)

    return pl.pallas_call(
        functools.partial(_matmul_act_kernel, act=act),
        out_shape=jax.ShapeDtypeStruct((m_p, cout_p), jnp.float32),
        grid=(m_p // tile_m,),
        in_specs=[pl.BlockSpec((tile_m, kd_p), lambda i: (i, 0)),
                  pl.BlockSpec((kd_p, cout_p), lambda i: (0, 0))],
        out_specs=pl.BlockSpec((tile_m, cout_p), lambda i: (i, 0)),
        compiler_params=pltpu.CompilerParams(
            dimension_semantics=("parallel",),
            vmem_limit_bytes=VMEM_LIMIT),
        cost_estimate=cost,
    )(p, w)


def _pad_rows_lanes(y):
    m, c = y.shape
    _, m_p = _tiles(m)
    c_p = _round_up(c, LANE)
    if (m_p, c_p) == (m, c):
        return y
    return jnp.zeros((m_p, c_p), y.dtype).at[:m, :c].set(y)


def _pallas_bn_act(y_pad, m_valid, act):
    """Training-mode BatchNorm2d (gamma=1, beta=0, biased var) + activation.

    y_pad: (M_pad, C_pad) f32 pre-BN values; rows >= m_valid and padded lane
    columns are zero (true for both producers), so the sum/sumsq reduce gives
    exact batch statistics over the m_valid real rows.  Two-pass: XLA reduce for
    the stats, Pallas kernel for the fused per-row scale/shift + activation —
    correct under M-tiling.
    """
    m_p, c_p = y_pad.shape
    tile_m, m_chk = _tiles(m_valid)
    assert m_chk == m_p, (m_chk, m_p)

    s = jnp.sum(y_pad, axis=0)
    ss = jnp.sum(y_pad * y_pad, axis=0)
    mean = s / float(m_valid)
    var = jnp.maximum(ss / float(m_valid) - mean * mean, 0.0)
    inv = jax.lax.rsqrt(var + BN_EPS)
    scale = inv.reshape(1, c_p)
    shift = (-mean * inv).reshape(1, c_p)

    cost = pl.CostEstimate(flops=2 * m_p * c_p, transcendentals=0,
                           bytes_accessed=2 * m_p * c_p * 4 + 2 * c_p * 4)
    return pl.pallas_call(
        functools.partial(_bn_act_kernel, act=act),
        out_shape=jax.ShapeDtypeStruct((m_p, c_p), jnp.float32),
        grid=(m_p // tile_m,),
        in_specs=[pl.BlockSpec((tile_m, c_p), lambda i: (i, 0)),
                  pl.BlockSpec((1, c_p), lambda i: (0, 0)),
                  pl.BlockSpec((1, c_p), lambda i: (0, 0))],
        out_specs=pl.BlockSpec((tile_m, c_p), lambda i: (i, 0)),
        compiler_params=pltpu.CompilerParams(
            dimension_semantics=("parallel",),
            vmem_limit_bytes=VMEM_LIMIT),
        cost_estimate=cost,
    )(y_pad, scale, shift)


# ---------------------------------------------------------------------------
# Conv / ConvTranspose layers (NHWC)
# ---------------------------------------------------------------------------
# TODO(synk): fuse the K*K window gather into the matmul kernel (grid axis over
# (kh, kw) with manual strided DMA) to remove the K*K im2col HBM blowup; today
# the gather is plain XLA data movement feeding the Pallas matmul.
def _im2col_nhwc(x, k, stride):
    n, h, w, c = x.shape
    ho = (h - k) // stride + 1
    wo = (w - k) // stride + 1
    cols = []
    for kh in range(k):
        for kw in range(k):
            cols.append(x[:, kh:kh + (ho - 1) * stride + 1:stride,
                          kw:kw + (wo - 1) * stride + 1:stride, :])
    patches = jnp.concatenate(cols, axis=-1)          # (N, Ho, Wo, K*K*C)
    return patches.reshape(n * ho * wo, k * k * c), ho, wo


def conv_layer(x, w, stride, pad, bn, act):
    """x: (N,H,W,Cin) NHWC; w: (Cout,Cin,K,K) as in nn.Conv2d(bias=False)."""
    cout, cin, k, _ = w.shape
    n = x.shape[0]
    if pad > 0:
        x = jnp.pad(x, ((0, 0), (pad, pad), (pad, pad), (0, 0)))
    patches, ho, wo = _im2col_nhwc(x, k, stride)
    w_t = jnp.transpose(w, (2, 3, 1, 0)).reshape(k * k * cin, cout)
    m = patches.shape[0]
    y_pad = _pallas_matmul(patches, w_t, "none" if bn else act)
    if bn:
        y_pad = _pallas_bn_act(y_pad, m, act)
    return y_pad[:m, :cout].reshape(n, ho, wo, cout)


# phase a (output-row parity) at 2x2 window offset d uses original kernel tap
# kh = _SUBPIX_TAPS[a][d]; same map for columns.
_SUBPIX_TAPS = ((3, 1), (2, 0))


def _convt_subpixel_weight(w):
    """(Cin,Cout,4,4) ConvTranspose2d(stride=2,pad=1) weight -> (4*Cin, 4*Cout)
    matmul weight over 2x2 input windows; output columns grouped by phase
    g = 2*a + b (a, b = output row/col parity)."""
    cin, cout = w.shape[0], w.shape[1]
    blocks = []
    for a in range(2):
        for b in range(2):
            sub = w[:, :, list(_SUBPIX_TAPS[a]), :][:, :, :, list(_SUBPIX_TAPS[b])]
            # sub[ci, co, dh, dw] -> rows ordered (dh, dw, ci) to match im2col
            blocks.append(jnp.transpose(sub, (2, 3, 0, 1)).reshape(4 * cin, cout))
    return jnp.concatenate(blocks, axis=1)


def convt_layer(x, w, stride, pad, bn, act):
    """x: (N,H,W,Cin) NHWC; w: (Cin,Cout,K,K) as in nn.ConvTranspose2d(bias=False)."""
    cin, cout, k, _ = w.shape
    n, h, wd, _ = x.shape

    if h == 1 and wd == 1 and stride == 1 and pad == 0:
        # 1x1 -> KxK: a plain matmul (N, Cin) @ (Cin, K*K*Cout).
        w_t = jnp.transpose(w, (0, 2, 3, 1)).reshape(cin, k * k * cout)
        y_pad = _pallas_matmul(x.reshape(n, cin), w_t, "none" if bn else act)
        y = y_pad[:n, :k * k * cout].reshape(n, k, k, cout)
        if bn:
            flat = y.reshape(n * k * k, cout)
            yb = _pallas_bn_act(_pad_rows_lanes(flat), n * k * k, act)
            y = yb[:n * k * k, :cout].reshape(n, k, k, cout)
        return y

    assert stride == 2 and k == 4 and pad == 1, "sub-pixel path expects DCGAN geometry"
    # Sub-pixel lowering: out[2i+a, 2j+b] only touches a 2x2 input window, so run
    # ONE matmul over 2x2 windows of the once-padded input producing 4 phase
    # groups of Cout channels, then interleave.  No zero-dilated input: ~4x fewer
    # MACs and far less patch traffic than the dilation lowering.
    xp = jnp.pad(x, ((0, 0), (1, 1), (1, 1), (0, 0)))
    patches, po, qo = _im2col_nhwc(xp, 2, 1)           # po = H+1, qo = W+1
    w_all = _convt_subpixel_weight(w)                  # (4*Cin, 4*Cout)
    m1 = n * po * qo
    y_pad = _pallas_matmul(patches, w_all, "none" if bn else act)
    yph = y_pad[:m1, :4 * cout].reshape(n, po, qo, 4, cout)

    oh, ow = 2 * h, 2 * wd
    out = jnp.zeros((n, oh, ow, cout), jnp.float32)
    for a in range(2):
        for b in range(2):
            g = 2 * a + b
            out = out.at[:, a::2, b::2, :].set(yph[:, a:a + h, b:b + wd, g, :])
    if bn:
        flat = out.reshape(n * oh * ow, cout)
        yb = _pallas_bn_act(_pad_rows_lanes(flat), n * oh * ow, act)
        out = yb[:n * oh * ow, :cout].reshape(n, oh, ow, cout)
    return out


# ---------------------------------------------------------------------------
# Network plans (mirror the PyTorch __init__ loops), weights, forward
# ---------------------------------------------------------------------------
def encoder_plan(image_size, nz, nc, ndf):
    assert image_size % 16 == 0, "imageSize has to be a multiple of 16"
    plan = [dict(kind="conv", cin=nc, cout=ndf, k=4, stride=2, pad=1,
                 bn=False, act="lrelu")]
    csize, cndf = image_size // 2, ndf
    while csize > 4:
        plan.append(dict(kind="conv", cin=cndf, cout=cndf * 2, k=4, stride=2,
                         pad=1, bn=True, act="lrelu"))
        cndf *= 2
        csize //= 2
    plan.append(dict(kind="conv", cin=cndf, cout=nz, k=4, stride=1, pad=0,
                     bn=False, act="none"))
    return tuple(plan)


def decoder_plan(image_size, nz, nc, ngf):
    assert image_size % 16 == 0, "imageSize has to be a multiple of 16"
    cngf, tsize = ngf // 2, 4
    while tsize != image_size:
        cngf *= 2
        tsize *= 2
    plan = [dict(kind="convt", cin=nz, cout=cngf, k=4, stride=1, pad=0,
                 bn=True, act="relu")]
    csize = 4
    while csize < image_size // 2:
        plan.append(dict(kind="convt", cin=cngf, cout=cngf // 2, k=4, stride=2,
                         pad=1, bn=True, act="relu"))
        cngf //= 2
        csize *= 2
    plan.append(dict(kind="convt", cin=cngf, cout=nc, k=4, stride=2, pad=1,
                     bn=False, act="tanh"))
    return tuple(plan)


def init_weights(key, plan):
    keys = jax.random.split(key, len(plan))
    ws = []
    for spec, k in zip(plan, keys):
        if spec["kind"] == "conv":
            shape = (spec["cout"], spec["cin"], spec["k"], spec["k"])
        else:
            shape = (spec["cin"], spec["cout"], spec["k"], spec["k"])
        ws.append(0.02 * jax.random.normal(k, shape, dtype=jnp.float32))
    return ws


def apply_plan(x_nhwc, plan, weights):
    for spec, w in zip(plan, weights):
        fn = conv_layer if spec["kind"] == "conv" else convt_layer
        x_nhwc = fn(x_nhwc, w, spec["stride"], spec["pad"], spec["bn"], spec["act"])
    return x_nhwc


def make_netg(image_size, nz, nc, ngf):
    enc_plan = encoder_plan(image_size, nz, nc, ngf)
    dec_plan = decoder_plan(image_size, nz, nc, ngf)

    def init(key):
        k1, k2, k3 = jax.random.split(key, 3)
        return {"enc1": init_weights(k1, enc_plan),
                "dec": init_weights(k2, dec_plan),
                "enc2": init_weights(k3, enc_plan)}

    # TODO(synk): for tiny configs the whole NetG fits in VMEM; a single fused
    # pallas_call keeping all weights/activations resident would remove the
    # remaining per-layer launch + HBM round trips.
    @jax.jit
    def forward(x_nchw, weights):
        x = jnp.transpose(x_nchw, (0, 2, 3, 1))            # NCHW -> NHWC once
        latent_i = apply_plan(x, enc_plan, weights["enc1"])
        gen_imag = apply_plan(latent_i, dec_plan, weights["dec"])
        latent_o = apply_plan(gen_imag, enc_plan, weights["enc2"])
        to_nchw = lambda t: jnp.transpose(t, (0, 3, 1, 2))  # back to PyTorch layout
        return to_nchw(gen_imag), to_nchw(latent_i), to_nchw(latent_o)

    return init, forward


# ---------------------------------------------------------------------------
if __name__ == "__main__":
    # Small config: imageSize=16 (multiple of 16), nz=8, nc=4, ngf=ndf=8, batch=2
    image_size, nz, nc, ngf = 16, 8, 4, 8

    init, forward = make_netg(image_size, nz, nc, ngf)

    key = jax.random.PRNGKey(0)
    k_x, k_p = jax.random.split(key)
    weights = init(k_p)
    x = jax.random.normal(k_x, (2, nc, image_size, image_size), dtype=jnp.float32)

    gen_imag, latent_i, latent_o = forward(x, weights)
    jax.block_until_ready((gen_imag, latent_i, latent_o))

    assert gen_imag.shape == (2, nc, image_size, image_size)
    assert latent_i.shape == (2, nz, 1, 1)
    assert latent_o.shape == (2, nz, 1, 1)
    assert bool(jnp.all(jnp.isfinite(gen_imag)))
    assert bool(jnp.all(jnp.isfinite(latent_i)))
    assert bool(jnp.all(jnp.isfinite(latent_o)))
    assert float(jnp.max(jnp.abs(gen_imag))) <= 1.0 + 1e-4   # final tanh range
    print("KERNEL_OK")
</pallas_src>

<mosaic_0001>
module attributes {stable_mosaic.version = 11 : i64} {
  func.func @_matmul_act_kernel(%arg0: i32, %arg1: memref<128x128xbf16, #tpu.memory_space<vmem>>, %arg2: memref<128x128xbf16, #tpu.memory_space<vmem>>, %arg3: memref<128x128xf32, #tpu.memory_space<vmem>>) attributes {dimension_semantics = [#tpu.dimension_semantics<parallel>], iteration_bounds = array<i64: 1>, scalar_prefetch = 0 : i64, scratch_operands = 0 : i64, tpu.core_type = #tpu.core_type<tc>, window_params = [{transform_indices = @transform_0, window_bounds = array<i64: 128, 128>}, {pipeline_mode = #tpu.pipeline_mode<synchronous>, transform_indices = @transform_1, window_bounds = array<i64: 128, 128>}, {transform_indices = @transform_2, window_bounds = array<i64: 128, 128>}]} {
    %c0 = arith.constant 0 : index
    %c0_0 = arith.constant 0 : index
    %0 = vector.load %arg1[%c0, %c0_0] : memref<128x128xbf16, #tpu.memory_space<vmem>>, vector<128x128xbf16>
    %c0_1 = arith.constant 0 : index
    %c0_2 = arith.constant 0 : index
    %1 = vector.load %arg2[%c0_1, %c0_2] : memref<128x128xbf16, #tpu.memory_space<vmem>>, vector<128x128xbf16>
    %cst = arith.constant dense<0.000000e+00> : vector<128x128xf32>
    %2 = tpu.matmul %0, %1, %cst {dimension_numbers = #tpu.dot_dimension_numbers<[1], [0], [0], [1], [0, 0, 1, 1], [], []>} : vector<128x128xbf16>, vector<128x128xbf16>, vector<128x128xf32> -> vector<128x128xf32>
    %cst_3 = arith.constant 0.000000e+00 : f32
    %3 = vector.broadcast %cst_3 : f32 to vector<128x128xf32>
    %4 = arith.cmpf oge, %2, %3 : vector<128x128xf32>
    %cst_4 = arith.constant 2.000000e-01 : f32
    %5 = vector.broadcast %cst_4 : f32 to vector<128x128xf32>
    %6 = arith.mulf %5, %2 : vector<128x128xf32>
    %7 = arith.select %4, %2, %6 : vector<128x128xi1>, vector<128x128xf32>
    %c0_5 = arith.constant 0 : index
    %c0_6 = arith.constant 0 : index
    %8 = vector.load %arg3[%c0_5, %c0_6] : memref<128x128xf32, #tpu.memory_space<vmem>>, vector<128x128xf32>
    tpu.vector_store %arg3[%c0_5, %c0_6], %7 {strides = array<i32>} : memref<128x128xf32, #tpu.memory_space<vmem>>, vector<128x128xf32>,
    return
  }
  func.func @transform_0(%arg0: i32) -> (i32, i32) {
    %c0_i32 = arith.constant 0 : i32
    %c0_i32_0 = arith.constant 0 : i32
    return %arg0, %c0_i32 : i32, i32
  }
  func.func @transform_1(%arg0: i32) -> (i32, i32) {
    %c0_i32 = arith.constant 0 : i32
    %c0_i32_0 = arith.constant 0 : i32
    %c0_i32_1 = arith.constant 0 : i32
    return %c0_i32, %c0_i32_0 : i32, i32
  }
  func.func @transform_2(%arg0: i32) -> (i32, i32) {
    %c0_i32 = arith.constant 0 : i32
    %c0_i32_0 = arith.constant 0 : i32
    return %arg0, %c0_i32 : i32, i32
  }
}

module attributes {stable_mosaic.version = 11 : i64} {
  func.func @_bn_act_kernel(%arg0: i32, %arg1: memref<32x128xf32, #tpu.memory_space<vmem>>, %arg2: memref<1x128xf32, #tpu.memory_space<vmem>>, %arg3: memref<1x128xf32, #tpu.memory_space<vmem>>, %arg4: memref<32x128xf32, #tpu.memory_space<vmem>>) attributes {dimension_semantics = [#tpu.dimension_semantics<parallel>], iteration_bounds = array<i64: 1>, scalar_prefetch = 0 : i64, scratch_operands = 0 : i64, tpu.core_type = #tpu.core_type<tc>, window_params = [{transform_indices = @transform_0, window_bounds = array<i64: 32, 128>}, {pipeline_mode = #tpu.pipeline_mode<synchronous>, transform_indices = @transform_1, window_bounds = array<i64: 1, 128>}, {pipeline_mode = #tpu.pipeline_mode<synchronous>, transform_indices = @transform_2, window_bounds = array<i64: 1, 128>}, {transform_indices = @transform_3, window_bounds = array<i64: 32, 128>}]} {
    %c0 = arith.constant 0 : index
    %c0_0 = arith.constant 0 : index
    %0 = vector.load %arg1[%c0, %c0_0] : memref<32x128xf32, #tpu.memory_space<vmem>>, vector<32x128xf32>
    %c0_1 = arith.constant 0 : index
    %c0_2 = arith.constant 0 : index
    %1 = vector.load %arg2[%c0_1, %c0_2] : memref<1x128xf32, #tpu.memory_space<vmem>>, vector<1x128xf32>
    %2 = vector.broadcast %1 : vector<1x128xf32> to vector<32x128xf32>
    %3 = arith.mulf %0, %2 : vector<32x128xf32>
    %c0_3 = arith.constant 0 : index
    %c0_4 = arith.constant 0 : index
    %4 = vector.load %arg3[%c0_3, %c0_4] : memref<1x128xf32, #tpu.memory_space<vmem>>, vector<1x128xf32>
    %5 = vector.broadcast %4 : vector<1x128xf32> to vector<32x128xf32>
    %6 = arith.addf %3, %5 : vector<32x128xf32>
    %cst = arith.constant 0.000000e+00 : f32
    %7 = vector.broadcast %cst : f32 to vector<32x128xf32>
    %8 = arith.cmpf oge, %6, %7 : vector<32x128xf32>
    %cst_5 = arith.constant 2.000000e-01 : f32
    %9 = vector.broadcast %cst_5 : f32 to vector<32x128xf32>
    %10 = arith.mulf %9, %6 : vector<32x128xf32>
    %11 = arith.select %8, %6, %10 : vector<32x128xi1>, vector<32x128xf32>
    %c0_6 = arith.constant 0 : index
    %c0_7 = arith.constant 0 : index
    %12 = vector.load %arg4[%c0_6, %c0_7] : memref<32x128xf32, #tpu.memory_space<vmem>>, vector<32x128xf32>
    tpu.vector_store %arg4[%c0_6, %c0_7], %11 {strides = array<i32>} : memref<32x128xf32, #tpu.memory_space<vmem>>, vector<32x128xf32>,
    return
  }
  func.func @transform_0(%arg0: i32) -> (i32, i32) {
    %c0_i32 = arith.constant 0 : i32
    %c0_i32_0 = arith.constant 0 : i32
    return %arg0, %c0_i32 : i32, i32
  }
  func.func @transform_1(%arg0: i32) -> (i32, i32) {
    %c0_i32 = arith.constant 0 : i32
    %c0_i32_0 = arith.constant 0 : i32
    %c0_i32_1 = arith.constant 0 : i32
    return %c0_i32, %c0_i32_0 : i32, i32
  }
  func.func @transform_2(%arg0: i32) -> (i32, i32) {
    %c0_i32 = arith.constant 0 : i32
    %c0_i32_0 = arith.constant 0 : i32
    %c0_i32_1 = arith.constant 0 : i32
    return %c0_i32, %c0_i32_0 : i32, i32
  }
  func.func @transform_3(%arg0: i32) -> (i32, i32) {
    %c0_i32 = arith.constant 0 : i32
    %c0_i32_0 = arith.constant 0 : i32
    return %arg0, %c0_i32 : i32, i32
  }
}

module attributes {stable_mosaic.version = 11 : i64} {
  func.func @_matmul_act_kernel(%arg0: i32, %arg1: memref<32x128xbf16, #tpu.memory_space<vmem>>, %arg2: memref<128x128xbf16, #tpu.memory_space<vmem>>, %arg3: memref<32x128xf32, #tpu.memory_space<vmem>>) attributes {dimension_semantics = [#tpu.dimension_semantics<parallel>], iteration_bounds = array<i64: 1>, scalar_prefetch = 0 : i64, scratch_operands = 0 : i64, tpu.core_type = #tpu.core_type<tc>, window_params = [{transform_indices = @transform_0, window_bounds = array<i64: 32, 128>}, {pipeline_mode = #tpu.pipeline_mode<synchronous>, transform_indices = @transform_1, window_bounds = array<i64: 128, 128>}, {transform_indices = @transform_2, window_bounds = array<i64: 32, 128>}]} {
    %c0 = arith.constant 0 : index
    %c0_0 = arith.constant 0 : index
    %0 = vector.load %arg1[%c0, %c0_0] : memref<32x128xbf16, #tpu.memory_space<vmem>>, vector<32x128xbf16>
    %c0_1 = arith.constant 0 : index
    %c0_2 = arith.constant 0 : index
    %1 = vector.load %arg2[%c0_1, %c0_2] : memref<128x128xbf16, #tpu.memory_space<vmem>>, vector<128x128xbf16>
    %cst = arith.constant dense<0.000000e+00> : vector<32x128xf32>
    %2 = tpu.matmul %0, %1, %cst {dimension_numbers = #tpu.dot_dimension_numbers<[1], [0], [0], [1], [0, 0, 1, 1], [], []>} : vector<32x128xbf16>, vector<128x128xbf16>, vector<32x128xf32> -> vector<32x128xf32>
    %c0_3 = arith.constant 0 : index
    %c0_4 = arith.constant 0 : index
    %3 = vector.load %arg3[%c0_3, %c0_4] : memref<32x128xf32, #tpu.memory_space<vmem>>, vector<32x128xf32>
    tpu.vector_store %arg3[%c0_3, %c0_4], %2 {strides = array<i32>} : memref<32x128xf32, #tpu.memory_space<vmem>>, vector<32x128xf32>,
    return
  }
  func.func @transform_0(%arg0: i32) -> (i32, i32) {
    %c0_i32 = arith.constant 0 : i32
    %c0_i32_0 = arith.constant 0 : i32
    return %arg0, %c0_i32 : i32, i32
  }
  func.func @transform_1(%arg0: i32) -> (i32, i32) {
    %c0_i32 = arith.constant 0 : i32
    %c0_i32_0 = arith.constant 0 : i32
    %c0_i32_1 = arith.constant 0 : i32
    return %c0_i32, %c0_i32_0 : i32, i32
  }
  func.func @transform_2(%arg0: i32) -> (i32, i32) {
    %c0_i32 = arith.constant 0 : i32
    %c0_i32_0 = arith.constant 0 : i32
    return %arg0, %c0_i32 : i32, i32
  }
}

module attributes {stable_mosaic.version = 11 : i64} {
  func.func @_matmul_act_kernel(%arg0: i32, %arg1: memref<8x256xbf16, #tpu.memory_space<vmem>>, %arg2: memref<256x128xbf16, #tpu.memory_space<vmem>>, %arg3: memref<8x128xf32, #tpu.memory_space<vmem>>) attributes {dimension_semantics = [#tpu.dimension_semantics<parallel>], iteration_bounds = array<i64: 1>, scalar_prefetch = 0 : i64, scratch_operands = 0 : i64, tpu.core_type = #tpu.core_type<tc>, window_params = [{transform_indices = @transform_0, window_bounds = array<i64: 8, 256>}, {pipeline_mode = #tpu.pipeline_mode<synchronous>, transform_indices = @transform_1, window_bounds = array<i64: 256, 128>}, {transform_indices = @transform_2, window_bounds = array<i64: 8, 128>}]} {
    %c0 = arith.constant 0 : index
    %c0_0 = arith.constant 0 : index
    %0 = vector.load %arg1[%c0, %c0_0] : memref<8x256xbf16, #tpu.memory_space<vmem>>, vector<8x256xbf16>
    %c0_1 = arith.constant 0 : index
    %c0_2 = arith.constant 0 : index
    %1 = vector.load %arg2[%c0_1, %c0_2] : memref<256x128xbf16, #tpu.memory_space<vmem>>, vector<256x128xbf16>
    %cst = arith.constant dense<0.000000e+00> : vector<8x128xf32>
    %2 = tpu.matmul %0, %1, %cst {dimension_numbers = #tpu.dot_dimension_numbers<[1], [0], [0], [1], [0, 0, 1, 1], [], []>} : vector<8x256xbf16>, vector<256x128xbf16>, vector<8x128xf32> -> vector<8x128xf32>
    %c0_3 = arith.constant 0 : index
    %c0_4 = arith.constant 0 : index
    %3 = vector.load %arg3[%c0_3, %c0_4] : memref<8x128xf32, #tpu.memory_space<vmem>>, vector<8x128xf32>
    tpu.vector_store %arg3[%c0_3, %c0_4], %2 {strides = array<i32>} : memref<8x128xf32, #tpu.memory_space<vmem>>, vector<8x128xf32>,
    return
  }
  func.func @transform_0(%arg0: i32) -> (i32, i32) {
    %c0_i32 = arith.constant 0 : i32
    %c0_i32_0 = arith.constant 0 : i32
    return %arg0, %c0_i32 : i32, i32
  }
  func.func @transform_1(%arg0: i32) -> (i32, i32) {
    %c0_i32 = arith.constant 0 : i32
    %c0_i32_0 = arith.constant 0 : i32
    %c0_i32_1 = arith.constant 0 : i32
    return %c0_i32, %c0_i32_0 : i32, i32
  }
  func.func @transform_2(%arg0: i32) -> (i32, i32) {
    %c0_i32 = arith.constant 0 : i32
    %c0_i32_0 = arith.constant 0 : i32
    return %arg0, %c0_i32 : i32, i32
  }
}

module attributes {stable_mosaic.version = 11 : i64} {
  func.func @_matmul_act_kernel(%arg0: i32, %arg1: memref<8x128xbf16, #tpu.memory_space<vmem>>, %arg2: memref<128x256xbf16, #tpu.memory_space<vmem>>, %arg3: memref<8x256xf32, #tpu.memory_space<vmem>>) attributes {dimension_semantics = [#tpu.dimension_semantics<parallel>], iteration_bounds = array<i64: 1>, scalar_prefetch = 0 : i64, scratch_operands = 0 : i64, tpu.core_type = #tpu.core_type<tc>, window_params = [{transform_indices = @transform_0, window_bounds = array<i64: 8, 128>}, {pipeline_mode = #tpu.pipeline_mode<synchronous>, transform_indices = @transform_1, window_bounds = array<i64: 128, 256>}, {transform_indices = @transform_2, window_bounds = array<i64: 8, 256>}]} {
    %c0 = arith.constant 0 : index
    %c0_0 = arith.constant 0 : index
    %0 = vector.load %arg1[%c0, %c0_0] : memref<8x128xbf16, #tpu.memory_space<vmem>>, vector<8x128xbf16>
    %c0_1 = arith.constant 0 : index
    %c0_2 = arith.constant 0 : index
    %1 = vector.load %arg2[%c0_1, %c0_2] : memref<128x256xbf16, #tpu.memory_space<vmem>>, vector<128x256xbf16>
    %cst = arith.constant dense<0.000000e+00> : vector<8x256xf32>
    %2 = tpu.matmul %0, %1, %cst {dimension_numbers = #tpu.dot_dimension_numbers<[1], [0], [0], [1], [0, 0, 1, 1], [], []>} : vector<8x128xbf16>, vector<128x256xbf16>, vector<8x256xf32> -> vector<8x256xf32>
    %c0_3 = arith.constant 0 : index
    %c0_4 = arith.constant 0 : index
    %3 = vector.load %arg3[%c0_3, %c0_4] : memref<8x256xf32, #tpu.memory_space<vmem>>, vector<8x256xf32>
    tpu.vector_store %arg3[%c0_3, %c0_4], %2 {strides = array<i32>} : memref<8x256xf32, #tpu.memory_space<vmem>>, vector<8x256xf32>,
    return
  }
  func.func @transform_0(%arg0: i32) -> (i32, i32) {
    %c0_i32 = arith.constant 0 : i32
    %c0_i32_0 = arith.constant 0 : i32
    return %arg0, %c0_i32 : i32, i32
  }
  func.func @transform_1(%arg0: i32) -> (i32, i32) {
    %c0_i32 = arith.constant 0 : i32
    %c0_i32_0 = arith.constant 0 : i32
    %c0_i32_1 = arith.constant 0 : i32
    return %c0_i32, %c0_i32_0 : i32, i32
  }
  func.func @transform_2(%arg0: i32) -> (i32, i32) {
    %c0_i32 = arith.constant 0 : i32
    %c0_i32_0 = arith.constant 0 : i32
    return %arg0, %c0_i32 : i32, i32
  }
}

module attributes {stable_mosaic.version = 11 : i64} {
  func.func @_bn_act_kernel(%arg0: i32, %arg1: memref<32x128xf32, #tpu.memory_space<vmem>>, %arg2: memref<1x128xf32, #tpu.memory_space<vmem>>, %arg3: memref<1x128xf32, #tpu.memory_space<vmem>>, %arg4: memref<32x128xf32, #tpu.memory_space<vmem>>) attributes {dimension_semantics = [#tpu.dimension_semantics<parallel>], iteration_bounds = array<i64: 1>, scalar_prefetch = 0 : i64, scratch_operands = 0 : i64, tpu.core_type = #tpu.core_type<tc>, window_params = [{transform_indices = @transform_0, window_bounds = array<i64: 32, 128>}, {pipeline_mode = #tpu.pipeline_mode<synchronous>, transform_indices = @transform_1, window_bounds = array<i64: 1, 128>}, {pipeline_mode = #tpu.pipeline_mode<synchronous>, transform_indices = @transform_2, window_bounds = array<i64: 1, 128>}, {transform_indices = @transform_3, window_bounds = array<i64: 32, 128>}]} {
    %c0 = arith.constant 0 : index
    %c0_0 = arith.constant 0 : index
    %0 = vector.load %arg1[%c0, %c0_0] : memref<32x128xf32, #tpu.memory_space<vmem>>, vector<32x128xf32>
    %c0_1 = arith.constant 0 : index
    %c0_2 = arith.constant 0 : index
    %1 = vector.load %arg2[%c0_1, %c0_2] : memref<1x128xf32, #tpu.memory_space<vmem>>, vector<1x128xf32>
    %2 = vector.broadcast %1 : vector<1x128xf32> to vector<32x128xf32>
    %3 = arith.mulf %0, %2 : vector<32x128xf32>
    %c0_3 = arith.constant 0 : index
    %c0_4 = arith.constant 0 : index
    %4 = vector.load %arg3[%c0_3, %c0_4] : memref<1x128xf32, #tpu.memory_space<vmem>>, vector<1x128xf32>
    %5 = vector.broadcast %4 : vector<1x128xf32> to vector<32x128xf32>
    %6 = arith.addf %3, %5 : vector<32x128xf32>
    %cst = arith.constant 0.000000e+00 : f32
    %7 = vector.broadcast %cst : f32 to vector<32x128xf32>
    %8 = arith.maximumf %6, %7 : vector<32x128xf32>
    %c0_5 = arith.constant 0 : index
    %c0_6 = arith.constant 0 : index
    %9 = vector.load %arg4[%c0_5, %c0_6] : memref<32x128xf32, #tpu.memory_space<vmem>>, vector<32x128xf32>
    tpu.vector_store %arg4[%c0_5, %c0_6], %8 {strides = array<i32>} : memref<32x128xf32, #tpu.memory_space<vmem>>, vector<32x128xf32>,
    return
  }
  func.func @transform_0(%arg0: i32) -> (i32, i32) {
    %c0_i32 = arith.constant 0 : i32
    %c0_i32_0 = arith.constant 0 : i32
    return %arg0, %c0_i32 : i32, i32
  }
  func.func @transform_1(%arg0: i32) -> (i32, i32) {
    %c0_i32 = arith.constant 0 : i32
    %c0_i32_0 = arith.constant 0 : i32
    %c0_i32_1 = arith.constant 0 : i32
    return %c0_i32, %c0_i32_0 : i32, i32
  }
  func.func @transform_2(%arg0: i32) -> (i32, i32) {
    %c0_i32 = arith.constant 0 : i32
    %c0_i32_0 = arith.constant 0 : i32
    %c0_i32_1 = arith.constant 0 : i32
    return %c0_i32, %c0_i32_0 : i32, i32
  }
  func.func @transform_3(%arg0: i32) -> (i32, i32) {
    %c0_i32 = arith.constant 0 : i32
    %c0_i32_0 = arith.constant 0 : i32
    return %arg0, %c0_i32 : i32, i32
  }
}

module attributes {stable_mosaic.version = 11 : i64} {
  func.func @_matmul_act_kernel(%arg0: i32, %arg1: memref<56x128xbf16, #tpu.memory_space<vmem>>, %arg2: memref<128x128xbf16, #tpu.memory_space<vmem>>, %arg3: memref<56x128xf32, #tpu.memory_space<vmem>>) attributes {dimension_semantics = [#tpu.dimension_semantics<parallel>], iteration_bounds = array<i64: 1>, scalar_prefetch = 0 : i64, scratch_operands = 0 : i64, tpu.core_type = #tpu.core_type<tc>, window_params = [{transform_indices = @transform_0, window_bounds = array<i64: 56, 128>}, {pipeline_mode = #tpu.pipeline_mode<synchronous>, transform_indices = @transform_1, window_bounds = array<i64: 128, 128>}, {transform_indices = @transform_2, window_bounds = array<i64: 56, 128>}]} {
    %c0 = arith.constant 0 : index
    %c0_0 = arith.constant 0 : index
    %0 = vector.load %arg1[%c0, %c0_0] : memref<56x128xbf16, #tpu.memory_space<vmem>>, vector<56x128xbf16>
    %c0_1 = arith.constant 0 : index
    %c0_2 = arith.constant 0 : index
    %1 = vector.load %arg2[%c0_1, %c0_2] : memref<128x128xbf16, #tpu.memory_space<vmem>>, vector<128x128xbf16>
    %cst = arith.constant dense<0.000000e+00> : vector<56x128xf32>
    %2 = tpu.matmul %0, %1, %cst {dimension_numbers = #tpu.dot_dimension_numbers<[1], [0], [0], [1], [0, 0, 1, 1], [], []>} : vector<56x128xbf16>, vector<128x128xbf16>, vector<56x128xf32> -> vector<56x128xf32>
    %c0_3 = arith.constant 0 : index
    %c0_4 = arith.constant 0 : index
    %3 = vector.load %arg3[%c0_3, %c0_4] : memref<56x128xf32, #tpu.memory_space<vmem>>, vector<56x128xf32>
    tpu.vector_store %arg3[%c0_3, %c0_4], %2 {strides = array<i32>} : memref<56x128xf32, #tpu.memory_space<vmem>>, vector<56x128xf32>,
    return
  }
  func.func @transform_0(%arg0: i32) -> (i32, i32) {
    %c0_i32 = arith.constant 0 : i32
    %c0_i32_0 = arith.constant 0 : i32
    return %arg0, %c0_i32 : i32, i32
  }
  func.func @transform_1(%arg0: i32) -> (i32, i32) {
    %c0_i32 = arith.constant 0 : i32
    %c0_i32_0 = arith.constant 0 : i32
    %c0_i32_1 = arith.constant 0 : i32
    return %c0_i32, %c0_i32_0 : i32, i32
  }
  func.func @transform_2(%arg0: i32) -> (i32, i32) {
    %c0_i32 = arith.constant 0 : i32
    %c0_i32_0 = arith.constant 0 : i32
    return %arg0, %c0_i32 : i32, i32
  }
}

module attributes {stable_mosaic.version = 11 : i64} {
  func.func @_bn_act_kernel(%arg0: i32, %arg1: memref<128x128xf32, #tpu.memory_space<vmem>>, %arg2: memref<1x128xf32, #tpu.memory_space<vmem>>, %arg3: memref<1x128xf32, #tpu.memory_space<vmem>>, %arg4: memref<128x128xf32, #tpu.memory_space<vmem>>) attributes {dimension_semantics = [#tpu.dimension_semantics<parallel>], iteration_bounds = array<i64: 1>, scalar_prefetch = 0 : i64, scratch_operands = 0 : i64, tpu.core_type = #tpu.core_type<tc>, window_params = [{transform_indices = @transform_0, window_bounds = array<i64: 128, 128>}, {pipeline_mode = #tpu.pipeline_mode<synchronous>, transform_indices = @transform_1, window_bounds = array<i64: 1, 128>}, {pipeline_mode = #tpu.pipeline_mode<synchronous>, transform_indices = @transform_2, window_bounds = array<i64: 1, 128>}, {transform_indices = @transform_3, window_bounds = array<i64: 128, 128>}]} {
    %c0 = arith.constant 0 : index
    %c0_0 = arith.constant 0 : index
    %0 = vector.load %arg1[%c0, %c0_0] : memref<128x128xf32, #tpu.memory_space<vmem>>, vector<128x128xf32>
    %c0_1 = arith.constant 0 : index
    %c0_2 = arith.constant 0 : index
    %1 = vector.load %arg2[%c0_1, %c0_2] : memref<1x128xf32, #tpu.memory_space<vmem>>, vector<1x128xf32>
    %2 = vector.broadcast %1 : vector<1x128xf32> to vector<128x128xf32>
    %3 = arith.mulf %0, %2 : vector<128x128xf32>
    %c0_3 = arith.constant 0 : index
    %c0_4 = arith.constant 0 : index
    %4 = vector.load %arg3[%c0_3, %c0_4] : memref<1x128xf32, #tpu.memory_space<vmem>>, vector<1x128xf32>
    %5 = vector.broadcast %4 : vector<1x128xf32> to vector<128x128xf32>
    %6 = arith.addf %3, %5 : vector<128x128xf32>
    %cst = arith.constant 0.000000e+00 : f32
    %7 = vector.broadcast %cst : f32 to vector<128x128xf32>
    %8 = arith.maximumf %6, %7 : vector<128x128xf32>
    %c0_5 = arith.constant 0 : index
    %c0_6 = arith.constant 0 : index
    %9 = vector.load %arg4[%c0_5, %c0_6] : memref<128x128xf32, #tpu.memory_space<vmem>>, vector<128x128xf32>
    tpu.vector_store %arg4[%c0_5, %c0_6], %8 {strides = array<i32>} : memref<128x128xf32, #tpu.memory_space<vmem>>, vector<128x128xf32>,
    return
  }
  func.func @transform_0(%arg0: i32) -> (i32, i32) {
    %c0_i32 = arith.constant 0 : i32
    %c0_i32_0 = arith.constant 0 : i32
    return %arg0, %c0_i32 : i32, i32
  }
  func.func @transform_1(%arg0: i32) -> (i32, i32) {
    %c0_i32 = arith.constant 0 : i32
    %c0_i32_0 = arith.constant 0 : i32
    %c0_i32_1 = arith.constant 0 : i32
    return %c0_i32, %c0_i32_0 : i32, i32
  }
  func.func @transform_2(%arg0: i32) -> (i32, i32) {
    %c0_i32 = arith.constant 0 : i32
    %c0_i32_0 = arith.constant 0 : i32
    %c0_i32_1 = arith.constant 0 : i32
    return %c0_i32, %c0_i32_0 : i32, i32
  }
  func.func @transform_3(%arg0: i32) -> (i32, i32) {
    %c0_i32 = arith.constant 0 : i32
    %c0_i32_0 = arith.constant 0 : i32
    return %arg0, %c0_i32 : i32, i32
  }
}

module attributes {stable_mosaic.version = 11 : i64} {
  func.func @_matmul_act_kernel(%arg0: i32, %arg1: memref<168x128xbf16, #tpu.memory_space<vmem>>, %arg2: memref<128x128xbf16, #tpu.memory_space<vmem>>, %arg3: memref<168x128xf32, #tpu.memory_space<vmem>>) attributes {dimension_semantics = [#tpu.dimension_semantics<parallel>], iteration_bounds = array<i64: 1>, scalar_prefetch = 0 : i64, scratch_operands = 0 : i64, tpu.core_type = #tpu.core_type<tc>, window_params = [{transform_indices = @transform_0, window_bounds = array<i64: 168, 128>}, {pipeline_mode = #tpu.pipeline_mode<synchronous>, transform_indices = @transform_1, window_bounds = array<i64: 128, 128>}, {transform_indices = @transform_2, window_bounds = array<i64: 168, 128>}]} {
    %c0 = arith.constant 0 : index
    %c0_0 = arith.constant 0 : index
    %0 = vector.load %arg1[%c0, %c0_0] : memref<168x128xbf16, #tpu.memory_space<vmem>>, vector<168x128xbf16>
    %c0_1 = arith.constant 0 : index
    %c0_2 = arith.constant 0 : index
    %1 = vector.load %arg2[%c0_1, %c0_2] : memref<128x128xbf16, #tpu.memory_space<vmem>>, vector<128x128xbf16>
    %cst = arith.constant dense<0.000000e+00> : vector<168x128xf32>
    %2 = tpu.matmul %0, %1, %cst {dimension_numbers = #tpu.dot_dimension_numbers<[1], [0], [0], [1], [0, 0, 1, 1], [], []>} : vector<168x128xbf16>, vector<128x128xbf16>, vector<168x128xf32> -> vector<168x128xf32>
    %3 = math.tanh %2 : vector<168x128xf32>
    %c0_3 = arith.constant 0 : index
    %c0_4 = arith.constant 0 : index
    %4 = vector.load %arg3[%c0_3, %c0_4] : memref<168x128xf32, #tpu.memory_space<vmem>>, vector<168x128xf32>
    tpu.vector_store %arg3[%c0_3, %c0_4], %3 {strides = array<i32>} : memref<168x128xf32, #tpu.memory_space<vmem>>, vector<168x128xf32>,
    return
  }
  func.func @transform_0(%arg0: i32) -> (i32, i32) {
    %c0_i32 = arith.constant 0 : i32
    %c0_i32_0 = arith.constant 0 : i32
    return %arg0, %c0_i32 : i32, i32
  }
  func.func @transform_1(%arg0: i32) -> (i32, i32) {
    %c0_i32 = arith.constant 0 : i32
    %c0_i32_0 = arith.constant 0 : i32
    %c0_i32_1 = arith.constant 0 : i32
    return %c0_i32, %c0_i32_0 : i32, i32
  }
  func.func @transform_2(%arg0: i32) -> (i32, i32) {
    %c0_i32 = arith.constant 0 : i32
    %c0_i32_0 = arith.constant 0 : i32
    return %arg0, %c0_i32 : i32, i32
  }
}

</mosaic_0001>

<bundles_post_ra>
// kernel: forward.13
= control target key start
LH: loop header
LB: loop body
LE: loop exit
PB: predicated region body
PF: predicated region fallthrough
CT: control target
= control target key end

     0   :  { %s471_s1 = inlined_call_operand.vmem [shape: bf16[128,128], index: 1, kind: input, shape index: {}]   ;;  %s472_s0 = inlined_call_operand.vmem [shape: bf16[128,128], index: 0, kind: input, shape index: {}]   ;;  %s473_s2 = inlined_call_operand.vmem [shape: f32[128,128], index: 2, kind: output, shape index: {}]  }
   0x1   :  { %v335_v0 = vld [vmem:[%s471_s1 + $0x38] sm:$0xff]  ;;  %v334_v1 = vld [vmem:[%s471_s1 + $0x30] sm:$0xff]  ;;  %v333_v2 = vld [vmem:[%s471_s1 + $0x28] sm:$0xff] }
   0x2   :  { %139 = vmatpush.bf16.msra.mxu0 %v335_v0  ;;  %336 = vmatpush.bf16.msra.mxu1 %v335_v0  ;;  %v332_v3 = vld [vmem:[%s471_s1 + $0x20] sm:$0xff]  ;;  %v331_v4 = vld [vmem:[%s471_s1 + $0x18] sm:$0xff]  ;;  %v330_v5 = vld [vmem:[%s471_s1 + $0x10] sm:$0xff] }
   0x3   :  { %337 = vmatpush.bf16.msra.mxu2 %v335_v0  ;;  %338 = vmatpush.bf16.msra.mxu3 %v335_v0  ;;  %v329_v6 = vld [vmem:[%s471_s1 + $0x8] sm:$0xff]  ;;  %v328_v7 = vld [vmem:[%s471_s1] sm:$0xff]  ;;  %v322_v9 = vld [vmem:[%s472_s0 + $0x10] sm:$0xff] }
   0x4   :  { %v320_v8 = vld [vmem:[%s472_s0] sm:$0xff]  ;;  %v326_v11 = vld [vmem:[%s472_s0 + $0x30] sm:$0xff]  ;;  %v321_v12 = vld [vmem:[%s472_s0 + $0x8] sm:$0xff] }
   0x5   :  { %v324_v10 = vld [vmem:[%s472_s0 + $0x20] sm:$0xff]  ;;  %v323_v13 = vld [vmem:[%s472_s0 + $0x18] sm:$0xff]  ;;  %v325_v14 = vld [vmem:[%s472_s0 + $0x28] sm:$0xff] }
   0x6   :  { %140 = vmatpush.bf16.msra.mxu0 %v334_v1  ;;  %339 = vmatpush.bf16.msra.mxu1 %v334_v1  ;;  %v327_v15 = vld [vmem:[%s472_s0 + $0x38] sm:$0xff] }
   0x7   :  { %340 = vmatpush.bf16.msra.mxu2 %v334_v1  ;;  %341 = vmatpush.bf16.msra.mxu3 %v334_v1 }
   0xa   :  { %141 = vmatpush.bf16.msra.mxu0 %v333_v2  ;;  %342 = vmatpush.bf16.msra.mxu1 %v333_v2 }
   0xb   :  { %343 = vmatpush.bf16.msra.mxu2 %v333_v2  ;;  %344 = vmatpush.bf16.msra.mxu3 %v333_v2 }
   0xe   :  { %142 = vmatpush.bf16.msra.mxu0 %v332_v3  ;;  %345 = vmatpush.bf16.msra.mxu1 %v332_v3 }
   0xf   :  { %346 = vmatpush.bf16.msra.mxu2 %v332_v3  ;;  %347 = vmatpush.bf16.msra.mxu3 %v332_v3 }
  0x12   :  { %143 = vmatpush.bf16.msra.mxu0 %v331_v4  ;;  %348 = vmatpush.bf16.msra.mxu1 %v331_v4 }
  0x13   :  { %349 = vmatpush.bf16.msra.mxu2 %v331_v4  ;;  %350 = vmatpush.bf16.msra.mxu3 %v331_v4 }
  0x16   :  { %144 = vmatpush.bf16.msra.mxu0 %v330_v5  ;;  %351 = vmatpush.bf16.msra.mxu1 %v330_v5 }
  0x17   :  { %352 = vmatpush.bf16.msra.mxu2 %v330_v5  ;;  %353 = vmatpush.bf16.msra.mxu3 %v330_v5 }
  0x1a   :  { %145 = vmatpush.bf16.msra.mxu0 %v329_v6  ;;  %354 = vmatpush.bf16.msra.mxu1 %v329_v6 }
  0x1b   :  { %355 = vmatpush.bf16.msra.mxu2 %v329_v6  ;;  %356 = vmatpush.bf16.msra.mxu3 %v329_v6 }
  0x1e   :  { %146 = vmatpush.bf16.msra.mxu0 %v328_v7  ;;  %357 = vmatpush.bf16.msra.mxu1 %v328_v7 }
  0x1f   :  { %358 = vmatpush.bf16.msra.mxu2 %v328_v7  ;;  %359 = vmatpush.bf16.msra.mxu3 %v328_v7 }
  0x21   :  { %147 = vmatmul.bf16.vlgmr.msra.gmra.mxu0 %v320_v8  ;;  %157 = vmatmul.bf16.vlgmr.msra.gmra.mxu1 %v322_v9 }
  0x22   :  { %167 = vmatmul.bf16.vlgmr.msra.gmra.mxu2 %v324_v10  ;;  %177 = vmatmul.bf16.vlgmr.msra.gmra.mxu3 %v326_v11 }
  0x31   :  { %152 = vmatmul.bf16.gmra.mxu0 %v321_v12  ;;  %162 = vmatmul.bf16.gmra.mxu1 %v323_v13 }
  0x32   :  { %172 = vmatmul.bf16.gmra.mxu2 %v325_v14  ;;  %182 = vmatmul.bf16.gmra.mxu3 %v327_v15 }
  0x9e   :  { %v148_v16 = vpop.f32.mrf.mxu0  ;;  %v158_v17 = vpop.f32.mrf.mxu1 }
  0x9f   :  { %vm188_vm0 = vcmp.ge.f32.partialorder %v148_v16, 0.0  ;;  %v204_v18 = vmul.f32 0.2, %v148_v16  ;;  %vm192_vm1 = vcmp.ge.f32.partialorder %v158_v17, 0.0  ;;  %v208_v19 = vmul.f32 0.2, %v158_v17 }
  0xa1   :  { %v220_v20 = vsel %vm188_vm0, %v148_v16, %v204_v18  ;;  %v224_v21 = vsel %vm192_vm1, %v158_v17, %v208_v19 }
  0xa2   :  { %236 = vst [vmem:[%s473_s2] sm:$0xff] %v220_v20 }
  0xa3   :  { %240 = vst [vmem:[%s473_s2 + $0x20] sm:$0xff] %v224_v21 }
  0xa5   :  { %v168_v22 = vpop.f32.mrf.mxu2  ;;  %v178_v23 = vpop.f32.mrf.mxu3 }
  0xa6   :  { %vm196_vm2 = vcmp.ge.f32.partialorder %v168_v22, 0.0  ;;  %v212_v24 = vmul.f32 0.2, %v168_v22  ;;  %vm200_vm3 = vcmp.ge.f32.partialorder %v178_v23, 0.0  ;;  %v216_v25 = vmul.f32 0.2, %v178_v23  ;;  %v150_v26 = vpop.f32.mrf.mxu0  ;;  %v160_v27 = vpop.f32.mrf.mxu1 }
  0xa7   :  { %vm189_vm4 = vcmp.ge.f32.partialorder %v150_v26, 0.0  ;;  %v205_v28 = vmul.f32 0.2, %v150_v26  ;;  %vm193_vm5 = vcmp.ge.f32.partialorder %v160_v27, 0.0  ;;  %v209_v29 = vmul.f32 0.2, %v160_v27 }
  0xa8   :  { %v228_v30 = vsel %vm196_vm2, %v168_v22, %v212_v24  ;;  %v232_v31 = vsel %vm200_vm3, %v178_v23, %v216_v25 }
  0xa9   :  { %244 = vst [vmem:[%s473_s2 + $0x40] sm:$0xff] %v228_v30  ;;  %v221_v32 = vsel %vm189_vm4, %v150_v26, %v205_v28  ;;  %v225_v33 = vsel %vm193_vm5, %v160_v27, %v209_v29 }
  0xaa   :  { %248 = vst [vmem:[%s473_s2 + $0x60] sm:$0xff] %v232_v31 }
  0xab   :  { %237 = vst [vmem:[%s473_s2 + $0x8] sm:$0xff] %v221_v32 }
  0xac   :  { %241 = vst [vmem:[%s473_s2 + $0x28] sm:$0xff] %v225_v33 }
  0xad   :  { %v170_v34 = vpop.f32.mrf.mxu2  ;;  %v180_v35 = vpop.f32.mrf.mxu3 }
  0xae   :  { %vm197_vm6 = vcmp.ge.f32.partialorder %v170_v34, 0.0  ;;  %v213_v36 = vmul.f32 0.2, %v170_v34  ;;  %vm201_vm7 = vcmp.ge.f32.partialorder %v180_v35, 0.0  ;;  %v217_v37 = vmul.f32 0.2, %v180_v35  ;;  %v153_v38 = vpop.f32.mrf.mxu0  ;;  %v163_v39 = vpop.f32.mrf.mxu1 }
  0xaf   :  { %vm190_vm8 = vcmp.ge.f32.partialorder %v153_v38, 0.0  ;;  %v206_v40 = vmul.f32 0.2, %v153_v38  ;;  %vm194_vm9 = vcmp.ge.f32.partialorder %v163_v39, 0.0  ;;  %v210_v41 = vmul.f32 0.2, %v163_v39 }
  0xb0   :  { %v229_v42 = vsel %vm197_vm6, %v170_v34, %v213_v36  ;;  %v233_v43 = vsel %vm201_vm7, %v180_v35, %v217_v37 }
  0xb1   :  { %245 = vst [vmem:[%s473_s2 + $0x48] sm:$0xff] %v229_v42  ;;  %v222_v44 = vsel %vm190_vm8, %v153_v38, %v206_v40  ;;  %v226_v45 = vsel %vm194_vm9, %v163_v39, %v210_v41 }
  0xb2   :  { %249 = vst [vmem:[%s473_s2 + $0x68] sm:$0xff] %v233_v43 }
  0xb3   :  { %238 = vst [vmem:[%s473_s2 + $0x10] sm:$0xff] %v222_v44 }
  0xb4   :  { %242 = vst [vmem:[%s473_s2 + $0x30] sm:$0xff] %v226_v45 }
  0xb5   :  { %v173_v46 = vpop.f32.mrf.mxu2  ;;  %v183_v47 = vpop.f32.mrf.mxu3 }
  0xb6   :  { %vm198_vm10 = vcmp.ge.f32.partialorder %v173_v46, 0.0  ;;  %v214_v48 = vmul.f32 0.2, %v173_v46  ;;  %vm202_vm11 = vcmp.ge.f32.partialorder %v183_v47, 0.0  ;;  %v218_v49 = vmul.f32 0.2, %v183_v47  ;;  %v155_v50 = vpop.f32.mrf.mxu0  ;;  %v165_v51 = vpop.f32.mrf.mxu1 }
  0xb7   :  { %vm191_vm12 = vcmp.ge.f32.partialorder %v155_v50, 0.0  ;;  %v207_v52 = vmul.f32 0.2, %v155_v50  ;;  %vm195_vm13 = vcmp.ge.f32.partialorder %v165_v51, 0.0  ;;  %v211_v53 = vmul.f32 0.2, %v165_v51 }
  0xb8   :  { %v230_v54 = vsel %vm198_vm10, %v173_v46, %v214_v48  ;;  %v234_v55 = vsel %vm202_vm11, %v183_v47, %v218_v49 }
  0xb9   :  { %246 = vst [vmem:[%s473_s2 + $0x50] sm:$0xff] %v230_v54  ;;  %v223_v56 = vsel %vm191_vm12, %v155_v50, %v207_v52  ;;  %v227_v57 = vsel %vm195_vm13, %v165_v51, %v211_v53 }
  0xba   :  { %250 = vst [vmem:[%s473_s2 + $0x70] sm:$0xff] %v234_v55 }
  0xbb   :  { %239 = vst [vmem:[%s473_s2 + $0x18] sm:$0xff] %v223_v56 }
  0xbc   :  { %243 = vst [vmem:[%s473_s2 + $0x38] sm:$0xff] %v227_v57 }
  0xbd   :  { %v175_v58 = vpop.f32.mrf.mxu2  ;;  %v185_v59 = vpop.f32.mrf.mxu3 }
  0xbe   :  { %vm199_vm14 = vcmp.ge.f32.partialorder %v175_v58, 0.0  ;;  %v215_v60 = vmul.f32 0.2, %v175_v58  ;;  %vm203_vm15 = vcmp.ge.f32.partialorder %v185_v59, 0.0  ;;  %v219_v61 = vmul.f32 0.2, %v185_v59 }
  0xc0   :  { %v231_v62 = vsel %vm199_vm14, %v175_v58, %v215_v60  ;;  %v235_v63 = vsel %vm203_vm15, %v185_v59, %v219_v61 }
  0xc1   :  { %247 = vst [vmem:[%s473_s2 + $0x58] sm:$0xff] %v231_v62 }
  0xc2   :  { %251 = vst [vmem:[%s473_s2 + $0x78] sm:$0xff] %v235_v63 }

// kernel: forward.15
= control target key start
LH: loop header
LB: loop body
LE: loop exit
PB: predicated region body
PF: predicated region fallthrough
CT: control target
= control target key end

     0   :  { %s106_s0 = inlined_call_operand.vmem [shape: f32[32,128], index: 0, kind: input, shape index: {}]   ;;  %s107_s1 = inlined_call_operand.vmem [shape: f32[1,128], index: 1, kind: input, shape index: {}]   ;;  %s108_s2 = inlined_call_operand.vmem [shape: f32[1,128], index: 2, kind: input, shape index: {}]   ;;  %s109_s3 = inlined_call_operand.vmem [shape: f32[32,128], index: 3, kind: output, shape index: {}]  }
   0x1   :  { %v14_v0 = vld [vmem:[%s106_s0] sm:$0xff]  ;;  %v15_v3 = vld [vmem:[%s106_s0 + $0x8] sm:$0xff]  ;;  %v16_v6 = vld [vmem:[%s106_s0 + $0x10] sm:$0xff] }
   0x2   :  { %v54_v1 = vld [vmem:[%s107_s1] ss:$0 sm:$0xff]  ;;  %v17_v7 = vld [vmem:[%s106_s0 + $0x18] sm:$0xff] }
   0x3   :  { %v55_v2 = vld [vmem:[%s108_s2] ss:$0 sm:$0xff]  ;;  %v22_v4 = vmul.f32 %v54_v1, %v14_v0  ;;  %v23_v5 = vmul.f32 %v54_v1, %v15_v3  ;;  %v24_v8 = vmul.f32 %v54_v1, %v16_v6  ;;  %v25_v9 = vmul.f32 %v54_v1, %v17_v7 }
   0x5   :  { %v30_v10 = vadd.f32 %v55_v2, %v22_v4  ;;  %v31_v11 = vadd.f32 %v55_v2, %v23_v5  ;;  %v32_v12 = vadd.f32 %v55_v2, %v24_v8  ;;  %v33_v13 = vadd.f32 %v55_v2, %v25_v9 }
   0x7   :  { %vm34_vm0 = vcmp.ge.f32.partialorder %v30_v10, 0.0  ;;  %v38_v14 = vmul.f32 0.2, %v30_v10  ;;  %vm35_vm1 = vcmp.ge.f32.partialorder %v31_v11, 0.0  ;;  %v39_v15 = vmul.f32 0.2, %v31_v11 }
   0x8   :  { %vm36_vm2 = vcmp.ge.f32.partialorder %v32_v12, 0.0  ;;  %v40_v16 = vmul.f32 0.2, %v32_v12  ;;  %vm37_vm3 = vcmp.ge.f32.partialorder %v33_v13, 0.0  ;;  %v41_v17 = vmul.f32 0.2, %v33_v13 }
   0x9   :  { %v42_v18 = vsel %vm34_vm0, %v30_v10, %v38_v14  ;;  %v43_v19 = vsel %vm35_vm1, %v31_v11, %v39_v15 }
   0xa   :  { %46 = vst [vmem:[%s109_s3] sm:$0xff] %v42_v18  ;;  %v44_v20 = vsel %vm36_vm2, %v32_v12, %v40_v16  ;;  %v45_v21 = vsel %vm37_vm3, %v33_v13, %v41_v17 }
   0xb   :  { %47 = vst [vmem:[%s109_s3 + $0x8] sm:$0xff] %v43_v19 }
   0xc   :  { %48 = vst [vmem:[%s109_s3 + $0x10] sm:$0xff] %v44_v20 }
   0xd   :  { %49 = vst [vmem:[%s109_s3 + $0x18] sm:$0xff] %v45_v21 }

// kernel: forward.14
= control target key start
LH: loop header
LB: loop body
LE: loop exit
PB: predicated region body
PF: predicated region fallthrough
CT: control target
= control target key end

     0   :  { %s233_s1 = inlined_call_operand.vmem [shape: bf16[128,128], index: 1, kind: input, shape index: {}]   ;;  %s234_s0 = inlined_call_operand.vmem [shape: bf16[32,128], index: 0, kind: input, shape index: {}]   ;;  %s235_s2 = inlined_call_operand.vmem [shape: f32[32,128], index: 2, kind: output, shape index: {}]  }
   0x1   :  { %v167_v0 = vld [vmem:[%s233_s1 + $0x38] sm:$0xff]  ;;  %v166_v1 = vld [vmem:[%s233_s1 + $0x30] sm:$0xff]  ;;  %v165_v2 = vld [vmem:[%s233_s1 + $0x28] sm:$0xff] }
   0x2   :  { %91 = vmatpush.bf16.msra.mxu0 %v167_v0  ;;  %168 = vmatpush.bf16.msra.mxu1 %v167_v0  ;;  %v164_v3 = vld [vmem:[%s233_s1 + $0x20] sm:$0xff]  ;;  %v163_v4 = vld [vmem:[%s233_s1 + $0x18] sm:$0xff]  ;;  %v162_v5 = vld [vmem:[%s233_s1 + $0x10] sm:$0xff] }
   0x3   :  { %v161_v6 = vld [vmem:[%s233_s1 + $0x8] sm:$0xff]  ;;  %v160_v7 = vld [vmem:[%s233_s1] sm:$0xff] }
   0x4   :  { %v158_v8 = vld [vmem:[%s234_s0] sm:$0xff]  ;;  %v159_v9 = vld [vmem:[%s234_s0 + $0x8] sm:$0xff] }
   0x6   :  { %92 = vmatpush.bf16.msra.mxu0 %v166_v1  ;;  %169 = vmatpush.bf16.msra.mxu1 %v166_v1 }
   0xa   :  { %93 = vmatpush.bf16.msra.mxu0 %v165_v2  ;;  %170 = vmatpush.bf16.msra.mxu1 %v165_v2 }
   0xe   :  { %94 = vmatpush.bf16.msra.mxu0 %v164_v3  ;;  %171 = vmatpush.bf16.msra.mxu1 %v164_v3 }
  0x12   :  { %95 = vmatpush.bf16.msra.mxu0 %v163_v4  ;;  %172 = vmatpush.bf16.msra.mxu1 %v163_v4 }
  0x16   :  { %96 = vmatpush.bf16.msra.mxu0 %v162_v5  ;;  %173 = vmatpush.bf16.msra.mxu1 %v162_v5 }
  0x1a   :  { %97 = vmatpush.bf16.msra.mxu0 %v161_v6  ;;  %174 = vmatpush.bf16.msra.mxu1 %v161_v6 }
  0x1e   :  { %98 = vmatpush.bf16.msra.mxu0 %v160_v7  ;;  %175 = vmatpush.bf16.msra.mxu1 %v160_v7 }
  0x21   :  { %99 = vmatmul.bf16.vlgmr.msra.gmra.mxu0 %v158_v8  ;;  %104 = vmatmul.bf16.vlgmr.msra.gmra.mxu1 %v159_v9 }
  0x9e   :  { %v100_v10 = vpop.f32.mrf.mxu0  ;;  %v105_v11 = vpop.f32.mrf.mxu1 }
  0x9f   :  { %110 = vst [vmem:[%s235_s2] sm:$0xff] %v100_v10 }
  0xa0   :  { %112 = vst [vmem:[%s235_s2 + $0x10] sm:$0xff] %v105_v11 }
  0xa6   :  { %v102_v12 = vpop.f32.mrf.mxu0  ;;  %v107_v13 = vpop.f32.mrf.mxu1 }
  0xa7   :  { %111 = vst [vmem:[%s235_s2 + $0x8] sm:$0xff] %v102_v12 }
  0xa8   :  { %113 = vst [vmem:[%s235_s2 + $0x18] sm:$0xff] %v107_v13 }

// kernel: forward.16
= control target key start
LH: loop header
LB: loop body
LE: loop exit
PB: predicated region body
PF: predicated region fallthrough
CT: control target
= control target key end

     0   :  { %s327_s1 = inlined_call_operand.vmem [shape: bf16[256,128], index: 1, kind: input, shape index: {}]   ;;  %s328_s0 = inlined_call_operand.vmem [shape: bf16[8,256], index: 0, kind: input, shape index: {}]   ;;  %s329_s2 = inlined_call_operand.vmem [shape: f32[8,128], index: 2, kind: output, shape index: {}]  }
   0x1   :  { %v249_v0 = vld [vmem:[%s327_s1 + $0x38] sm:$0xff]  ;;  %v248_v2 = vld [vmem:[%s327_s1 + $0x30] sm:$0xff]  ;;  %v247_v4 = vld [vmem:[%s327_s1 + $0x28] sm:$0xff] }
   0x2   :  { %v257_v1 = vld [vmem:[%s327_s1 + $0x78] sm:$0xff]  ;;  %147 = vmatpush.bf16.msra.mxu0 %v249_v0  ;;  %v256_v3 = vld [vmem:[%s327_s1 + $0x70] sm:$0xff]  ;;  %v255_v5 = vld [vmem:[%s327_s1 + $0x68] sm:$0xff] }
   0x3   :  { %160 = vmatpush.bf16.msra.mxu1 %v257_v1  ;;  %v246_v6 = vld [vmem:[%s327_s1 + $0x20] sm:$0xff]  ;;  %v245_v8 = vld [vmem:[%s327_s1 + $0x18] sm:$0xff]  ;;  %v244_v10 = vld [vmem:[%s327_s1 + $0x10] sm:$0xff] }
   0x4   :  { %v254_v7 = vld [vmem:[%s327_s1 + $0x60] sm:$0xff]  ;;  %v253_v9 = vld [vmem:[%s327_s1 + $0x58] sm:$0xff]  ;;  %v252_v11 = vld [vmem:[%s327_s1 + $0x50] sm:$0xff] }
   0x5   :  { %v243_v12 = vld [vmem:[%s327_s1 + $0x8] sm:$0xff]  ;;  %v11_v14 = vld [vmem:[%s328_s0] sm:$0xff] }
   0x6   :  { %148 = vmatpush.bf16.msra.mxu0 %v248_v2  ;;  %v251_v13 = vld [vmem:[%s327_s1 + $0x48] sm:$0xff]  ;;  %v45_v15 = vunpack.c.l.b16 %v11_v14  ;;  %v46_v16 = vunpack.c.h.b16 %v11_v14  ;;  %v242_v17 = vld [vmem:[%s327_s1] sm:$0xff] }
   0x7   :  { %161 = vmatpush.bf16.msra.mxu1 %v256_v3  ;;  %v250_v18 = vld [vmem:[%s327_s1 + $0x40] sm:$0xff] }
   0x8   :  { %v47_v19 = vpack.c.b16 %v45_v15, %v45_v15  ;;  %v48_v20 = vpack.c.b16 %v46_v16, %v46_v16 }
   0xa   :  { %149 = vmatpush.bf16.msra.mxu0 %v247_v4 }
   0xb   :  { %162 = vmatpush.bf16.msra.mxu1 %v255_v5 }
   0xe   :  { %150 = vmatpush.bf16.msra.mxu0 %v246_v6 }
   0xf   :  { %163 = vmatpush.bf16.msra.mxu1 %v254_v7 }
  0x12   :  { %151 = vmatpush.bf16.msra.mxu0 %v245_v8 }
  0x13   :  { %164 = vmatpush.bf16.msra.mxu1 %v253_v9 }
  0x16   :  { %152 = vmatpush.bf16.msra.mxu0 %v244_v10 }
  0x17   :  { %165 = vmatpush.bf16.msra.mxu1 %v252_v11 }
  0x1a   :  { %153 = vmatpush.bf16.msra.mxu0 %v243_v12 }
  0x1b   :  { %166 = vmatpush.bf16.msra.mxu1 %v251_v13 }
  0x1e   :  { %154 = vmatpush.bf16.msra.mxu0 %v242_v17 }
  0x1f   :  { %167 = vmatpush.bf16.msra.mxu1 %v250_v18 }
  0x21   :  { %155 = vmatmul.bf16.vlgmr.msra.gmra.mxu0 %v47_v19 }
  0x22   :  { %168 = vmatmul.bf16.vlgmr.msra.gmra.mxu1 %v48_v20 }
  0x9e   :  { %v156_v21 = vpop.f32.mrf.mxu0 }
  0x9f   :  { %v169_v22 = vpop.f32.mrf.mxu1 }
  0xa0   :  { %v170_v23 = vadd.f32 %v169_v22, %v156_v21 }
  0xa2   :  { %173 = vst [vmem:[%s329_s2] sm:$0xff] %v170_v23 }
  0xa6   :  { %v158_v24 = vpop.f32.mrf.mxu0 }
  0xa7   :  { %v171_v25 = vpop.f32.mrf.mxu1 }

// kernel: forward.17
= control target key start
LH: loop header
LB: loop body
LE: loop exit
PB: predicated region body
PF: predicated region fallthrough
CT: control target
= control target key end

     0   :  { %s340_s1 = inlined_call_operand.vmem [shape: bf16[128,256], index: 1, kind: input, shape index: {}]   ;;  %s341_s0 = inlined_call_operand.vmem [shape: bf16[8,128], index: 0, kind: input, shape index: {}]   ;;  %s342_s2 = inlined_call_operand.vmem [shape: f32[8,256], index: 2, kind: output, shape index: {}]  }
   0x1   :  { %v198_v0 = vld [vmem:[%s340_s1 + $0x70] sm:$0xf]  ;;  %v219_v1 = vld [vmem:[%s340_s1 + $0x74] sm:$0xf0]  ;;  %v218_v2 = vld [vmem:[%s340_s1 + $0x74] sm:$0xf] }
   0x2   :  { %v199_v3 = vor.u32 %v219_v1, %v198_v0  ;;  %v200_v4 = vld [vmem:[%s340_s1 + $0x78] sm:$0xf0]  ;;  %v190_v5 = vld [vmem:[%s340_s1 + $0x60] sm:$0xf]  ;;  %v217_v6 = vld [vmem:[%s340_s1 + $0x64] sm:$0xf0] }
   0x3   :  { %v203_v7 = vor.u32 %v218_v2, %v200_v4  ;;  %v216_v8 = vld [vmem:[%s340_s1 + $0x64] sm:$0xf]  ;;  %v192_v9 = vld [vmem:[%s340_s1 + $0x68] sm:$0xf0]  ;;  %v191_v10 = vor.u32 %v217_v6, %v190_v5  ;;  %v182_v12 = vld [vmem:[%s340_s1 + $0x50] sm:$0xf] }
   0x4   :  { %108 = vmatpush.bf16.msra.mxu0 %v199_v3  ;;  %v195_v11 = vor.u32 %v216_v8, %v192_v9  ;;  %v215_v13 = vld [vmem:[%s340_s1 + $0x54] sm:$0xf0]  ;;  %v214_v14 = vld [vmem:[%s340_s1 + $0x54] sm:$0xf]  ;;  %v184_v15 = vld [vmem:[%s340_s1 + $0x58] sm:$0xf0] }
   0x5   :  { %121 = vmatpush.bf16.msra.mxu1 %v203_v7  ;;  %v183_v16 = vor.u32 %v215_v13, %v182_v12  ;;  %v187_v17 = vor.u32 %v214_v14, %v184_v15  ;;  %v174_v18 = vld [vmem:[%s340_s1 + $0x40] sm:$0xf]  ;;  %v213_v19 = vld [vmem:[%s340_s1 + $0x44] sm:$0xf0]  ;;  %v212_v20 = vld [vmem:[%s340_s1 + $0x44] sm:$0xf] }
   0x6   :  { %v176_v21 = vld [vmem:[%s340_s1 + $0x48] sm:$0xf0]  ;;  %v175_v22 = vor.u32 %v213_v19, %v174_v18  ;;  %v166_v24 = vld [vmem:[%s340_s1 + $0x30] sm:$0xf]  ;;  %v211_v25 = vld [vmem:[%s340_s1 + $0x34] sm:$0xf0] }
   0x7   :  { %v179_v23 = vor.u32 %v212_v20, %v176_v21  ;;  %v210_v26 = vld [vmem:[%s340_s1 + $0x34] sm:$0xf]  ;;  %v168_v27 = vld [vmem:[%s340_s1 + $0x38] sm:$0xf0]  ;;  %v167_v28 = vor.u32 %v211_v25, %v166_v24  ;;  %v158_v30 = vld [vmem:[%s340_s1 + $0x20] sm:$0xf] }
   0x8   :  { %109 = vmatpush.bf16.msra.mxu0 %v191_v10  ;;  %v171_v29 = vor.u32 %v210_v26, %v168_v27  ;;  %v209_v31 = vld [vmem:[%s340_s1 + $0x24] sm:$0xf0]  ;;  %v208_v32 = vld [vmem:[%s340_s1 + $0x24] sm:$0xf]  ;;  %v160_v33 = vld [vmem:[%s340_s1 + $0x28] sm:$0xf0] }
   0x9   :  { %122 = vmatpush.bf16.msra.mxu1 %v195_v11  ;;  %v159_v34 = vor.u32 %v209_v31, %v158_v30  ;;  %v163_v35 = vor.u32 %v208_v32, %v160_v33  ;;  %v150_v36 = vld [vmem:[%s340_s1 + $0x10] sm:$0xf]  ;;  %v207_v37 = vld [vmem:[%s340_s1 + $0x14] sm:$0xf0]  ;;  %v206_v38 = vld [vmem:[%s340_s1 + $0x14] sm:$0xf] }
   0xa   :  { %v152_v39 = vld [vmem:[%s340_s1 + $0x18] sm:$0xf0]  ;;  %v151_v40 = vor.u32 %v207_v37, %v150_v36  ;;  %v142_v42 = vld [vmem:[%s340_s1] sm:$0xf]  ;;  %v205_v43 = vld [vmem:[%s340_s1 + $0x4] sm:$0xf0] }
   0xb   :  { %v155_v41 = vor.u32 %v206_v38, %v152_v39  ;;  %v204_v44 = vld [vmem:[%s340_s1 + $0x4] sm:$0xf]  ;;  %v144_v45 = vld [vmem:[%s340_s1 + $0x8] sm:$0xf0]  ;;  %v143_v46 = vor.u32 %v205_v43, %v142_v42  ;;  %v11_v48 = vld [vmem:[%s341_s0] sm:$0xf] }
   0xc   :  { %110 = vmatpush.bf16.msra.mxu0 %v183_v16  ;;  %v147_v47 = vor.u32 %v204_v44, %v144_v45 }
   0xd   :  { %123 = vmatpush.bf16.msra.mxu1 %v187_v17 }
  0x10   :  { %111 = vmatpush.bf16.msra.mxu0 %v175_v22 }
  0x11   :  { %124 = vmatpush.bf16.msra.mxu1 %v179_v23 }
  0x14   :  { %112 = vmatpush.bf16.msra.mxu0 %v167_v28 }
  0x15   :  { %125 = vmatpush.bf16.msra.mxu1 %v171_v29 }
  0x18   :  { %113 = vmatpush.bf16.msra.mxu0 %v159_v34 }
  0x19   :  { %126 = vmatpush.bf16.msra.mxu1 %v163_v35 }
  0x1c   :  { %114 = vmatpush.bf16.msra.mxu0 %v151_v40 }
  0x1d   :  { %127 = vmatpush.bf16.msra.mxu1 %v155_v41 }
  0x20   :  { %115 = vmatpush.bf16.msra.mxu0 %v143_v46 }
  0x21   :  { %128 = vmatpush.bf16.msra.mxu1 %v147_v47 }
  0x23   :  { %116 = vmatmul.bf16.vlgmr.msra.gmra.mxu0 %v11_v48 }
  0x24   :  { %129 = vmatmul.bf16.vlgmr.msra.gmra.mxu1 %v11_v48 }
  0xa0   :  { %v117_v49 = vpop.f32.mrf.mxu0 }
  0xa1   :  { %134 = vst [vmem:[%s342_s2] sm:$0xff] %v117_v49  ;;  %v130_v50 = vpop.f32.mrf.mxu1 }
  0xa2   :  { %135 = vst [vmem:[%s342_s2 + $0x8] sm:$0xff] %v130_v50 }
  0xa8   :  { %v119_v51 = vpop.f32.mrf.mxu0 }
  0xa9   :  { %v132_v52 = vpop.f32.mrf.mxu1 }

// kernel: forward.18
= control target key start
LH: loop header
LB: loop body
LE: loop exit
PB: predicated region body
PF: predicated region fallthrough
CT: control target
= control target key end

     0   :  { %s98_s0 = inlined_call_operand.vmem [shape: f32[32,128], index: 0, kind: input, shape index: {}]   ;;  %s99_s1 = inlined_call_operand.vmem [shape: f32[1,128], index: 1, kind: input, shape index: {}]   ;;  %s100_s2 = inlined_call_operand.vmem [shape: f32[1,128], index: 2, kind: input, shape index: {}]   ;;  %s101_s3 = inlined_call_operand.vmem [shape: f32[32,128], index: 3, kind: output, shape index: {}]  }
   0x1   :  { %v14_v0 = vld [vmem:[%s98_s0] sm:$0xff]  ;;  %v15_v3 = vld [vmem:[%s98_s0 + $0x8] sm:$0xff]  ;;  %v16_v6 = vld [vmem:[%s98_s0 + $0x10] sm:$0xff] }
   0x2   :  { %v46_v1 = vld [vmem:[%s99_s1] ss:$0 sm:$0xff]  ;;  %v17_v7 = vld [vmem:[%s98_s0 + $0x18] sm:$0xff] }
   0x3   :  { %v47_v2 = vld [vmem:[%s100_s2] ss:$0 sm:$0xff]  ;;  %v22_v4 = vmul.f32 %v46_v1, %v14_v0  ;;  %v23_v5 = vmul.f32 %v46_v1, %v15_v3  ;;  %v24_v8 = vmul.f32 %v46_v1, %v16_v6  ;;  %v25_v9 = vmul.f32 %v46_v1, %v17_v7 }
   0x5   :  { %v30_v10 = vadd.f32 %v47_v2, %v22_v4  ;;  %v31_v11 = vadd.f32 %v47_v2, %v23_v5  ;;  %v32_v12 = vadd.f32 %v47_v2, %v24_v8  ;;  %v33_v13 = vadd.f32 %v47_v2, %v25_v9 }
   0x7   :  { %v34_v14 = vmax.f32 %v30_v10, 0.0  ;;  %v35_v15 = vmax.f32 %v31_v11, 0.0  ;;  %v36_v16 = vmax.f32 %v32_v12, 0.0  ;;  %v37_v17 = vmax.f32 %v33_v13, 0.0 }
   0x9   :  { %38 = vst [vmem:[%s101_s3] sm:$0xff] %v34_v14 }
   0xa   :  { %39 = vst [vmem:[%s101_s3 + $0x8] sm:$0xff] %v35_v15 }
   0xb   :  { %40 = vst [vmem:[%s101_s3 + $0x10] sm:$0xff] %v36_v16 }
   0xc   :  { %41 = vst [vmem:[%s101_s3 + $0x18] sm:$0xff] %v37_v17 }

// kernel: forward.19
= control target key start
LH: loop header
LB: loop body
LE: loop exit
PB: predicated region body
PF: predicated region fallthrough
CT: control target
= control target key end

     0   :  { %s294_s1 = inlined_call_operand.vmem [shape: bf16[128,128], index: 1, kind: input, shape index: {}]   ;;  %s295_s0 = inlined_call_operand.vmem [shape: bf16[56,128], index: 0, kind: input, shape index: {}]   ;;  %s296_s2 = inlined_call_operand.vmem [shape: f32[56,128], index: 2, kind: output, shape index: {}]  }
   0x1   :  { %v197_v0 = vld [vmem:[%s294_s1 + $0x38] sm:$0xff]  ;;  %v196_v1 = vld [vmem:[%s294_s1 + $0x30] sm:$0xff]  ;;  %v195_v2 = vld [vmem:[%s294_s1 + $0x28] sm:$0xff] }
   0x2   :  { %104 = vmatpush.bf16.msra.mxu0 %v197_v0  ;;  %198 = vmatpush.bf16.msra.mxu1 %v197_v0  ;;  %v194_v3 = vld [vmem:[%s294_s1 + $0x20] sm:$0xff]  ;;  %v193_v4 = vld [vmem:[%s294_s1 + $0x18] sm:$0xff]  ;;  %v192_v5 = vld [vmem:[%s294_s1 + $0x10] sm:$0xff] }
   0x3   :  { %199 = vmatpush.bf16.msra.mxu2 %v197_v0  ;;  %200 = vmatpush.bf16.msra.mxu3 %v197_v0  ;;  %v191_v6 = vld [vmem:[%s294_s1 + $0x8] sm:$0xff]  ;;  %v17_v7 = vld [vmem:[%s295_s0 + $0x18] sm:$0xf]  ;;  %v190_v8 = vld [vmem:[%s294_s1] sm:$0xff] }
   0x4   :  { %v47_v9 = vunpack.c.l.b16 %v17_v7  ;;  %v187_v10 = vld [vmem:[%s295_s0] sm:$0xff]  ;;  %v188_v11 = vld [vmem:[%s295_s0 + $0x8] sm:$0xff]  ;;  %v189_v12 = vld [vmem:[%s295_s0 + $0x10] sm:$0xff] }
   0x6   :  { %105 = vmatpush.bf16.msra.mxu0 %v196_v1  ;;  %201 = vmatpush.bf16.msra.mxu1 %v196_v1  ;;  %v51_v13 = vpack.c.b16 %v47_v9, %v47_v9 }
   0x7   :  { %202 = vmatpush.bf16.msra.mxu2 %v196_v1  ;;  %203 = vmatpush.bf16.msra.mxu3 %v196_v1 }
   0xa   :  { %106 = vmatpush.bf16.msra.mxu0 %v195_v2  ;;  %204 = vmatpush.bf16.msra.mxu1 %v195_v2 }
   0xb   :  { %205 = vmatpush.bf16.msra.mxu2 %v195_v2  ;;  %206 = vmatpush.bf16.msra.mxu3 %v195_v2 }
   0xe   :  { %107 = vmatpush.bf16.msra.mxu0 %v194_v3  ;;  %207 = vmatpush.bf16.msra.mxu1 %v194_v3 }
   0xf   :  { %208 = vmatpush.bf16.msra.mxu2 %v194_v3  ;;  %209 = vmatpush.bf16.msra.mxu3 %v194_v3 }
  0x12   :  { %108 = vmatpush.bf16.msra.mxu0 %v193_v4  ;;  %210 = vmatpush.bf16.msra.mxu1 %v193_v4 }
  0x13   :  { %211 = vmatpush.bf16.msra.mxu2 %v193_v4  ;;  %212 = vmatpush.bf16.msra.mxu3 %v193_v4 }
  0x16   :  { %109 = vmatpush.bf16.msra.mxu0 %v192_v5  ;;  %213 = vmatpush.bf16.msra.mxu1 %v192_v5 }
  0x17   :  { %214 = vmatpush.bf16.msra.mxu2 %v192_v5  ;;  %215 = vmatpush.bf16.msra.mxu3 %v192_v5 }
  0x1a   :  { %110 = vmatpush.bf16.msra.mxu0 %v191_v6  ;;  %216 = vmatpush.bf16.msra.mxu1 %v191_v6 }
  0x1b   :  { %217 = vmatpush.bf16.msra.mxu2 %v191_v6  ;;  %218 = vmatpush.bf16.msra.mxu3 %v191_v6 }
  0x1e   :  { %111 = vmatpush.bf16.msra.mxu0 %v190_v8  ;;  %219 = vmatpush.bf16.msra.mxu1 %v190_v8 }
  0x1f   :  { %220 = vmatpush.bf16.msra.mxu2 %v190_v8  ;;  %221 = vmatpush.bf16.msra.mxu3 %v190_v8 }
  0x21   :  { %112 = vmatmul.bf16.vlgmr.msra.gmra.mxu0 %v187_v10  ;;  %117 = vmatmul.bf16.vlgmr.msra.gmra.mxu1 %v188_v11 }
  0x22   :  { %122 = vmatmul.bf16.vlgmr.msra.gmra.mxu2 %v189_v12  ;;  %127 = vmatmul.bf16.vlgmr.msra.gmra.mxu3 %v51_v13 }
  0x9e   :  { %v113_v14 = vpop.f32.mrf.mxu0  ;;  %v118_v15 = vpop.f32.mrf.mxu1 }
  0x9f   :  { %132 = vst [vmem:[%s296_s2] sm:$0xff] %v113_v14 }
  0xa0   :  { %134 = vst [vmem:[%s296_s2 + $0x10] sm:$0xff] %v118_v15 }
  0xa5   :  { %v123_v16 = vpop.f32.mrf.mxu2  ;;  %v128_v17 = vpop.f32.mrf.mxu3 }
  0xa6   :  { %136 = vst [vmem:[%s296_s2 + $0x20] sm:$0xff] %v123_v16  ;;  %v115_v18 = vpop.f32.mrf.mxu0  ;;  %v120_v19 = vpop.f32.mrf.mxu1 }
  0xa7   :  { %138 = vst [vmem:[%s296_s2 + $0x30] sm:$0xff] %v128_v17 }
  0xa8   :  { %133 = vst [vmem:[%s296_s2 + $0x8] sm:$0xff] %v115_v18 }
  0xa9   :  { %135 = vst [vmem:[%s296_s2 + $0x18] sm:$0xff] %v120_v19 }
  0xad   :  { %v125_v20 = vpop.f32.mrf.mxu2  ;;  %v130_v21 = vpop.f32.mrf.mxu3 }
  0xae   :  { %137 = vst [vmem:[%s296_s2 + $0x28] sm:$0xff] %v125_v20 }

// kernel: forward.20
= control target key start
LH: loop header
LB: loop body
LE: loop exit
PB: predicated region body
PF: predicated region fallthrough
CT: control target
= control target key end

     0   :  { %s248_s0 = inlined_call_operand.vmem [shape: f32[128,128], index: 0, kind: input, shape index: {}]   ;;  %s249_s1 = inlined_call_operand.vmem [shape: f32[1,128], index: 1, kind: input, shape index: {}]   ;;  %s250_s2 = inlined_call_operand.vmem [shape: f32[1,128], index: 2, kind: input, shape index: {}]   ;;  %s251_s3 = inlined_call_operand.vmem [shape: f32[128,128], index: 3, kind: output, shape index: {}]  }
   0x1   :  { %v14_v0 = vld [vmem:[%s248_s0] sm:$0xff]  ;;  %v15_v3 = vld [vmem:[%s248_s0 + $0x8] sm:$0xff]  ;;  %v16_v6 = vld [vmem:[%s248_s0 + $0x10] sm:$0xff] }
   0x2   :  { %v106_v1 = vld [vmem:[%s249_s1] ss:$0 sm:$0xff]  ;;  %v17_v7 = vld [vmem:[%s248_s0 + $0x18] sm:$0xff]  ;;  %v19_v12 = vld [vmem:[%s248_s0 + $0x28] sm:$0xff] }
   0x3   :  { %v137_v2 = vld [vmem:[%s250_s2] ss:$0 sm:$0xff]  ;;  %v34_v4 = vmul.f32 %v106_v1, %v14_v0  ;;  %v35_v5 = vmul.f32 %v106_v1, %v15_v3  ;;  %v36_v9 = vmul.f32 %v106_v1, %v16_v6  ;;  %v37_v10 = vmul.f32 %v106_v1, %v17_v7  ;;  %v20_v13 = vld [vmem:[%s248_s0 + $0x30] sm:$0xff]  ;;  %v21_v14 = vld [vmem:[%s248_s0 + $0x38] sm:$0xff] }
   0x4   :  { %v18_v8 = vld [vmem:[%s248_s0 + $0x20] sm:$0xff]  ;;  %v39_v17 = vmul.f32 %v106_v1, %v19_v12  ;;  %v40_v18 = vmul.f32 %v106_v1, %v20_v13  ;;  %v41_v22 = vmul.f32 %v106_v1, %v21_v14  ;;  %v23_v24 = vld [vmem:[%s248_s0 + $0x48] sm:$0xff]  ;;  %v24_v29 = vld [vmem:[%s248_s0 + $0x50] sm:$0xff] }
   0x5   :  { %v38_v11 = vmul.f32 %v106_v1, %v18_v8  ;;  %v54_v15 = vadd.f32 %v137_v2, %v34_v4  ;;  %v55_v16 = vadd.f32 %v137_v2, %v35_v5  ;;  %v56_v19 = vadd.f32 %v137_v2, %v36_v9  ;;  %v22_v23 = vld [vmem:[%s248_s0 + $0x40] sm:$0xff]  ;;  %v25_v30 = vld [vmem:[%s248_s0 + $0x58] sm:$0xff]  ;;  %v27_v35 = vld [vmem:[%s248_s0 + $0x68] sm:$0xff] }
   0x6   :  { %v57_v20 = vadd.f32 %v137_v2, %v37_v10  ;;  %v59_v27 = vadd.f32 %v137_v2, %v39_v17  ;;  %v60_v28 = vadd.f32 %v137_v2, %v40_v18  ;;  %v26_v31 = vld [vmem:[%s248_s0 + $0x60] sm:$0xff]  ;;  %v61_v34 = vadd.f32 %v137_v2, %v41_v22  ;;  %v28_v36 = vld [vmem:[%s248_s0 + $0x70] sm:$0xff]  ;;  %v29_v41 = vld [vmem:[%s248_s0 + $0x78] sm:$0xff] }
   0x7   :  { %v58_v21 = vadd.f32 %v137_v2, %v38_v11  ;;  %v70_v25 = vmax.f32 %v54_v15, 0.0  ;;  %v71_v26 = vmax.f32 %v55_v16, 0.0  ;;  %v72_v32 = vmax.f32 %v56_v19, 0.0 }
   0x8   :  { %v73_v33 = vmax.f32 %v57_v20, 0.0  ;;  %v75_v38 = vmax.f32 %v59_v27, 0.0  ;;  %v42_v39 = vmul.f32 %v106_v1, %v22_v23  ;;  %v43_v40 = vmul.f32 %v106_v1, %v23_v24 }
   0x9   :  { %86 = vst [vmem:[%s251_s3] sm:$0xff] %v70_v25  ;;  %v74_v37 = vmax.f32 %v58_v21, 0.0  ;;  %v76_v42 = vmax.f32 %v60_v28, 0.0  ;;  %v44_v43 = vmul.f32 %v106_v1, %v24_v29  ;;  %v45_v44 = vmul.f32 %v106_v1, %v25_v30 }
   0xa   :  { %87 = vst [vmem:[%s251_s3 + $0x8] sm:$0xff] %v71_v26  ;;  %v46_v45 = vmul.f32 %v106_v1, %v26_v31  ;;  %v62_v46 = vadd.f32 %v137_v2, %v42_v39  ;;  %v63_v47 = vadd.f32 %v137_v2, %v43_v40  ;;  %v47_v48 = vmul.f32 %v106_v1, %v27_v35 }
   0xb   :  { %88 = vst [vmem:[%s251_s3 + $0x10] sm:$0xff] %v72_v32  ;;  %v48_v49 = vmul.f32 %v106_v1, %v28_v36  ;;  %v77_v50 = vmax.f32 %v61_v34, 0.0  ;;  %v64_v51 = vadd.f32 %v137_v2, %v44_v43  ;;  %v65_v52 = vadd.f32 %v137_v2, %v45_v44 }
   0xc   :  { %89 = vst [vmem:[%s251_s3 + $0x18] sm:$0xff] %v73_v33  ;;  %v49_v53 = vmul.f32 %v106_v1, %v29_v41  ;;  %v78_v54 = vmax.f32 %v62_v46, 0.0  ;;  %v66_v55 = vadd.f32 %v137_v2, %v46_v45  ;;  %v79_v56 = vmax.f32 %v63_v47, 0.0 }
   0xd   :  { %90 = vst [vmem:[%s251_s3 + $0x20] sm:$0xff] %v74_v37  ;;  %v67_v57 = vadd.f32 %v137_v2, %v47_v48  ;;  %v80_v58 = vmax.f32 %v64_v51, 0.0  ;;  %v68_v59 = vadd.f32 %v137_v2, %v48_v49  ;;  %v81_v60 = vmax.f32 %v65_v52, 0.0 }
   0xe   :  { %91 = vst [vmem:[%s251_s3 + $0x28] sm:$0xff] %v75_v38  ;;  %v69_v61 = vadd.f32 %v137_v2, %v49_v53  ;;  %v82_v62 = vmax.f32 %v66_v55, 0.0 }
   0xf   :  { %92 = vst [vmem:[%s251_s3 + $0x30] sm:$0xff] %v76_v42  ;;  %v83_v63 = vmax.f32 %v67_v57, 0.0  ;;  %v84_v0 = vmax.f32 %v68_v59, 0.0 }
  0x10   :  { %93 = vst [vmem:[%s251_s3 + $0x38] sm:$0xff] %v77_v50  ;;  %v85_v1 = vmax.f32 %v69_v61, 0.0 }
  0x11   :  { %94 = vst [vmem:[%s251_s3 + $0x40] sm:$0xff] %v78_v54 }
  0x12   :  { %95 = vst [vmem:[%s251_s3 + $0x48] sm:$0xff] %v79_v56 }
  0x13   :  { %96 = vst [vmem:[%s251_s3 + $0x50] sm:$0xff] %v80_v58 }
  0x14   :  { %97 = vst [vmem:[%s251_s3 + $0x58] sm:$0xff] %v81_v60 }
  0x15   :  { %98 = vst [vmem:[%s251_s3 + $0x60] sm:$0xff] %v82_v62 }
  0x16   :  { %99 = vst [vmem:[%s251_s3 + $0x68] sm:$0xff] %v83_v63 }
  0x17   :  { %100 = vst [vmem:[%s251_s3 + $0x70] sm:$0xff] %v84_v0 }
  0x18   :  { %101 = vst [vmem:[%s251_s3 + $0x78] sm:$0xff] %v85_v1 }

// kernel: forward.21
= control target key start
LH: loop header
LB: loop body
LE: loop exit
PB: predicated region body
PF: predicated region fallthrough
CT: control target
= control target key end

     0   :  { %s560_s1 = inlined_call_operand.vmem [shape: bf16[128,128], index: 1, kind: input, shape index: {}]   ;;  %s561_s0 = inlined_call_operand.vmem [shape: bf16[168,128], index: 0, kind: input, shape index: {}]   ;;  %s562_s2 = inlined_call_operand.vmem [shape: f32[168,128], index: 2, kind: output, shape index: {}]  }
   0x1   :  { %v358_v0 = vld [vmem:[%s560_s1 + $0x38] sm:$0xff]  ;;  %v357_v1 = vld [vmem:[%s560_s1 + $0x30] sm:$0xff]  ;;  %v356_v2 = vld [vmem:[%s560_s1 + $0x28] sm:$0xff] }
   0x2   :  { %359 = vmatpush.bf16.msra.mxu1 %v358_v0  ;;  %360 = vmatpush.bf16.msra.mxu2 %v358_v0  ;;  %v355_v3 = vld [vmem:[%s560_s1 + $0x20] sm:$0xff]  ;;  %v354_v4 = vld [vmem:[%s560_s1 + $0x18] sm:$0xff]  ;;  %v353_v5 = vld [vmem:[%s560_s1 + $0x10] sm:$0xff] }
   0x3   :  { %361 = vmatpush.bf16.msra.mxu3 %v358_v0  ;;  %160 = vmatpush.bf16.msra.mxu0 %v358_v0  ;;  %v352_v6 = vld [vmem:[%s560_s1 + $0x8] sm:$0xff]  ;;  %v351_v7 = vld [vmem:[%s560_s1] sm:$0xff]  ;;  %v343_v8 = vld [vmem:[%s561_s0 + $0x10] sm:$0xff] }
   0x4   :  { %v346_v9 = vld [vmem:[%s561_s0 + $0x28] sm:$0xff]  ;;  %v349_v10 = vld [vmem:[%s561_s0 + $0x40] sm:$0xff]  ;;  %v344_v12 = vld [vmem:[%s561_s0 + $0x18] sm:$0xff] }
   0x5   :  { %v341_v11 = vld [vmem:[%s561_s0] sm:$0xff]  ;;  %v347_v13 = vld [vmem:[%s561_s0 + $0x30] sm:$0xff]  ;;  %v350_v14 = vld [vmem:[%s561_s0 + $0x48] sm:$0xff] }
   0x6   :  { %362 = vmatpush.bf16.msra.mxu1 %v357_v1  ;;  %363 = vmatpush.bf16.msra.mxu2 %v357_v1  ;;  %v342_v15 = vld [vmem:[%s561_s0 + $0x8] sm:$0xff]  ;;  %v31_v16 = vld [vmem:[%s561_s0 + $0x50] sm:$0xf]  ;;  %v345_v18 = vld [vmem:[%s561_s0 + $0x20] sm:$0xff] }
   0x7   :  { %364 = vmatpush.bf16.msra.mxu3 %v357_v1  ;;  %161 = vmatpush.bf16.msra.mxu0 %v357_v1  ;;  %v89_v17 = vunpack.c.l.b16 %v31_v16  ;;  %v348_v19 = vld [vmem:[%s561_s0 + $0x38] sm:$0xff] }
   0x9   :  { %v100_v20 = vpack.c.b16 %v89_v17, %v89_v17 }
   0xa   :  { %365 = vmatpush.bf16.msra.mxu1 %v356_v2  ;;  %366 = vmatpush.bf16.msra.mxu2 %v356_v2 }
   0xb   :  { %367 = vmatpush.bf16.msra.mxu3 %v356_v2  ;;  %162 = vmatpush.bf16.msra.mxu0 %v356_v2 }
   0xe   :  { %368 = vmatpush.bf16.msra.mxu1 %v355_v3  ;;  %369 = vmatpush.bf16.msra.mxu2 %v355_v3 }
   0xf   :  { %370 = vmatpush.bf16.msra.mxu3 %v355_v3  ;;  %163 = vmatpush.bf16.msra.mxu0 %v355_v3 }
  0x12   :  { %371 = vmatpush.bf16.msra.mxu1 %v354_v4  ;;  %372 = vmatpush.bf16.msra.mxu2 %v354_v4 }
  0x13   :  { %373 = vmatpush.bf16.msra.mxu3 %v354_v4  ;;  %164 = vmatpush.bf16.msra.mxu0 %v354_v4 }
  0x16   :  { %374 = vmatpush.bf16.msra.mxu1 %v353_v5  ;;  %375 = vmatpush.bf16.msra.mxu2 %v353_v5 }
  0x17   :  { %376 = vmatpush.bf16.msra.mxu3 %v353_v5  ;;  %165 = vmatpush.bf16.msra.mxu0 %v353_v5 }
  0x1a   :  { %377 = vmatpush.bf16.msra.mxu1 %v352_v6  ;;  %378 = vmatpush.bf16.msra.mxu2 %v352_v6 }
  0x1b   :  { %379 = vmatpush.bf16.msra.mxu3 %v352_v6  ;;  %166 = vmatpush.bf16.msra.mxu0 %v352_v6 }
  0x1e   :  { %380 = vmatpush.bf16.msra.mxu1 %v351_v7  ;;  %381 = vmatpush.bf16.msra.mxu2 %v351_v7 }
  0x1f   :  { %382 = vmatpush.bf16.msra.mxu3 %v351_v7  ;;  %167 = vmatpush.bf16.msra.mxu0 %v351_v7 }
  0x21   :  { %178 = vmatmul.bf16.vlgmr.msra.gmra.mxu1 %v343_v8  ;;  %193 = vmatmul.bf16.vlgmr.msra.gmra.mxu2 %v346_v9 }
  0x22   :  { %208 = vmatmul.bf16.vlgmr.msra.gmra.mxu3 %v349_v10  ;;  %168 = vmatmul.bf16.vlgmr.msra.gmra.mxu0 %v341_v11 }
  0x31   :  { %183 = vmatmul.bf16.gmra.mxu1 %v344_v12  ;;  %198 = vmatmul.bf16.gmra.mxu2 %v347_v13 }
  0x32   :  { %213 = vmatmul.bf16.gmra.mxu3 %v350_v14  ;;  %173 = vmatmul.bf16.gmra.mxu0 %v342_v15 }
  0x41   :  { %188 = vmatmul.bf16.gmra.mxu1 %v345_v18  ;;  %203 = vmatmul.bf16.gmra.mxu2 %v348_v19 }
  0x42   :  { %218 = vmatmul.bf16.gmra.mxu3 %v100_v20 }
  0x9e   :  { %v179_v21 = vpop.f32.mrf.mxu1 }
  0x9f   :  { %383 = vtanh.f32 %v179_v21  ;;  %v169_v22 = vpop.f32.mrf.mxu0 }
  0xa0   :  { %385 = vtanh.f32 %v169_v22 }
  0xa4   :  { %v194_v23 = vpop.f32.mrf.mxu2 }
  0xa5   :  { %v384_v24 = vpop.eup %383  ;;  %387 = vtanh.f32 %v194_v23  ;;  %v209_v25 = vpop.f32.mrf.mxu3 }
  0xa6   :  { %v386_v26 = vpop.eup %385  ;;  %248 = vst [vmem:[%s562_s2 + $0x20] sm:$0xff] %v384_v24  ;;  %389 = vtanh.f32 %v209_v25  ;;  %v181_v27 = vpop.f32.mrf.mxu1 }
  0xa7   :  { %391 = vtanh.f32 %v181_v27  ;;  %244 = vst [vmem:[%s562_s2] sm:$0xff] %v386_v26  ;;  %v171_v28 = vpop.f32.mrf.mxu0 }
  0xa8   :  { %393 = vtanh.f32 %v171_v28 }
  0xab   :  { %v388_v29 = vpop.eup %387 }
  0xac   :  { %v390_v30 = vpop.eup %389  ;;  %254 = vst [vmem:[%s562_s2 + $0x50] sm:$0xff] %v388_v29  ;;  %v196_v31 = vpop.f32.mrf.mxu2 }
  0xad   :  { %v392_v32 = vpop.eup %391  ;;  %260 = vst [vmem:[%s562_s2 + $0x80] sm:$0xff] %v390_v30  ;;  %395 = vtanh.f32 %v196_v31  ;;  %v211_v33 = vpop.f32.mrf.mxu3 }
  0xae   :  { %v394_v34 = vpop.eup %393  ;;  %249 = vst [vmem:[%s562_s2 + $0x28] sm:$0xff] %v392_v32  ;;  %397 = vtanh.f32 %v211_v33  ;;  %v184_v35 = vpop.f32.mrf.mxu1 }
  0xaf   :  { %399 = vtanh.f32 %v184_v35  ;;  %245 = vst [vmem:[%s562_s2 + $0x8] sm:$0xff] %v394_v34  ;;  %v174_v36 = vpop.f32.mrf.mxu0 }
  0xb0   :  { %401 = vtanh.f32 %v174_v36 }
  0xb3   :  { %v396_v37 = vpop.eup %395 }
  0xb4   :  { %v398_v38 = vpop.eup %397  ;;  %255 = vst [vmem:[%s562_s2 + $0x58] sm:$0xff] %v396_v37  ;;  %v199_v39 = vpop.f32.mrf.mxu2 }
  0xb5   :  { %v400_v40 = vpop.eup %399  ;;  %261 = vst [vmem:[%s562_s2 + $0x88] sm:$0xff] %v398_v38  ;;  %403 = vtanh.f32 %v199_v39  ;;  %v214_v41 = vpop.f32.mrf.mxu3 }
  0xb6   :  { %v402_v42 = vpop.eup %401  ;;  %250 = vst [vmem:[%s562_s2 + $0x30] sm:$0xff] %v400_v40  ;;  %405 = vtanh.f32 %v214_v41  ;;  %v186_v43 = vpop.f32.mrf.mxu1 }
  0xb7   :  { %407 = vtanh.f32 %v186_v43  ;;  %246 = vst [vmem:[%s562_s2 + $0x10] sm:$0xff] %v402_v42  ;;  %v176_v44 = vpop.f32.mrf.mxu0 }
  0xb8   :  { %409 = vtanh.f32 %v176_v44 }
  0xbb   :  { %v404_v45 = vpop.eup %403 }
  0xbc   :  { %v406_v46 = vpop.eup %405  ;;  %256 = vst [vmem:[%s562_s2 + $0x60] sm:$0xff] %v404_v45  ;;  %v201_v47 = vpop.f32.mrf.mxu2 }
  0xbd   :  { %v408_v48 = vpop.eup %407  ;;  %262 = vst [vmem:[%s562_s2 + $0x90] sm:$0xff] %v406_v46  ;;  %411 = vtanh.f32 %v201_v47  ;;  %v216_v49 = vpop.f32.mrf.mxu3 }
  0xbe   :  { %v410_v50 = vpop.eup %409  ;;  %251 = vst [vmem:[%s562_s2 + $0x38] sm:$0xff] %v408_v48  ;;  %413 = vtanh.f32 %v216_v49  ;;  %v189_v51 = vpop.f32.mrf.mxu1 }
  0xbf   :  { %415 = vtanh.f32 %v189_v51  ;;  %247 = vst [vmem:[%s562_s2 + $0x18] sm:$0xff] %v410_v50 }
  0xc3   :  { %v412_v52 = vpop.eup %411 }
  0xc4   :  { %v414_v53 = vpop.eup %413  ;;  %257 = vst [vmem:[%s562_s2 + $0x68] sm:$0xff] %v412_v52  ;;  %v204_v54 = vpop.f32.mrf.mxu2 }
  0xc5   :  { %v416_v55 = vpop.eup %415  ;;  %263 = vst [vmem:[%s562_s2 + $0x98] sm:$0xff] %v414_v53  ;;  %417 = vtanh.f32 %v204_v54  ;;  %v219_v56 = vpop.f32.mrf.mxu3 }
  0xc6   :  { %252 = vst [vmem:[%s562_s2 + $0x40] sm:$0xff] %v416_v55  ;;  %419 = vtanh.f32 %v219_v56  ;;  %v191_v57 = vpop.f32.mrf.mxu1 }
  0xc7   :  { %421 = vtanh.f32 %v191_v57 }
  0xcb   :  { %v418_v58 = vpop.eup %417 }
  0xcc   :  { %v420_v59 = vpop.eup %419  ;;  %258 = vst [vmem:[%s562_s2 + $0x70] sm:$0xff] %v418_v58  ;;  %v206_v60 = vpop.f32.mrf.mxu2 }
  0xcd   :  { %v422_v61 = vpop.eup %421  ;;  %264 = vst [vmem:[%s562_s2 + $0xa0] sm:$0xff] %v420_v59  ;;  %423 = vtanh.f32 %v206_v60  ;;  %v221_v62 = vpop.f32.mrf.mxu3 }
  0xce   :  { %253 = vst [vmem:[%s562_s2 + $0x48] sm:$0xff] %v422_v61 }
  0xd3   :  { %v424_v63 = vpop.eup %423 }
  0xd4   :  { %259 = vst [vmem:[%s562_s2 + $0x78] sm:$0xff] %v424_v63 }

</bundles_post_ra>
